<compile_context>
chip_gen: v5e
topology: v5e:2x2
jax: 0.10.0
libtpu: 0.0.40
codegen_flags: <defaults>
</compile_context>

<pallas_src>
import functools

import jax
import jax.numpy as jnp
from jax import lax
from jax.experimental import pallas as pl
from jax.experimental.pallas import tpu as pltpu

LRELU_SLOPE = 0.2
BN_EPS = 1e-5
KW = 4  # conv kernel size

# ---- tiling knobs -----------------------------------------------------------
# Per-tile VMEM budget for the conv working set (double-buffered bf16 patch
# tile + output tile).  Conservative so it also fits v7x's 64 MiB VMEM;
# v5e/v6e (128 MiB) have extra headroom.
CONV_TILE_VMEM_BUDGET = 24 * 1024 * 1024
MAX_TILE_M = 8192
MIN_TILE_M = 512
VMEM_LIMIT = 48 * 1024 * 1024

COMPILER_PARAMS = pltpu.CompilerParams(
    # single M-tile grid axis; "parallel" so v7x's two TensorCores split it
    dimension_semantics=("parallel",),
    vmem_limit_bytes=VMEM_LIMIT,
)


def _round_up(v, m):
    return ((v + m - 1) // m) * m


def _m_tiling(nm, k_dim, cout):
    """Tile the fused N*Ho*Wo lane axis.  Returns (tile_m, nm_pad, grid_m)."""
    # bytes per lane column, double-buffered: bf16 patches + (<=f32) output tile
    per_col = 2 * (k_dim * 2 + cout * 4)
    cap = CONV_TILE_VMEM_BUDGET // max(per_col, 1)
    cap = max(MIN_TILE_M, min(MAX_TILE_M, (cap // 128) * 128))
    nm128 = _round_up(nm, 128)           # lane-dense even in the single-block path
    if nm128 <= cap:
        return nm128, nm128, 1
    nm_pad = _round_up(nm, cap)
    return cap, nm_pad, nm_pad // cap


# ---------------------------------------------------------------- kernels ----

def _conv_act_kernel(x_ref, w_ref, b_ref, o_ref, *, act):
    """(Cout, K) @ (K, TILE_M) + bias (+ LeakyReLU); lane-dense store."""
    y = jnp.dot(w_ref[...], x_ref[...], preferred_element_type=jnp.float32)
    y = y + b_ref[...]
    if act == "lrelu":
        y = jnp.where(y > 0, y, LRELU_SLOPE * y)
    o_ref[...] = y.astype(o_ref.dtype)


def _conv_stats_kernel(x_ref, w_ref, b_ref, o_ref, s_ref):
    """Conv + bias, plus fused per-tile BatchNorm partial sums [sum, sum(x^2)].

    Stats are computed from the f32 accumulator (pre-activation) so the
    separate stats pass (and its HBM re-read of the activation) is not needed.
    """
    y = jnp.dot(w_ref[...], x_ref[...], preferred_element_type=jnp.float32)
    y = y + b_ref[...]
    s_ref[:, 0:1] = jnp.sum(y, axis=1, keepdims=True)
    s_ref[:, 1:2] = jnp.sum(y * y, axis=1, keepdims=True)
    o_ref[...] = y.astype(o_ref.dtype)


def _bn_apply_kernel(x_ref, s_ref, t_ref, o_ref):
    """y = x * scale + shift (folded mean/var/gamma/beta), then LeakyReLU(0.2)."""
    y = x_ref[...].astype(jnp.float32) * s_ref[...] + t_ref[...]
    o_ref[...] = jnp.where(y > 0, y, LRELU_SLOPE * y)


# -------------------------------------------------------------- conv layer ---

def conv2d_pallas(x_cnhw, w2d, b2, *, stride, pad, act, out_dtype, with_stats):
    """NCHW-equivalent Conv2d (k=4) as a gridded, lane-dense Pallas matmul.

    x_cnhw : (C, N, H, W) float32 activation (internal channels-first-of-batch layout)
    w2d    : (Cout, 16*Cin) bfloat16, K ordered as (kh, kw, cin)   (prepared once)
    b2     : (Cout, 1) float32
    Returns (y_flat, stats_or_None, meta) with y_flat of shape (Cout, NM_pad).
    """
    c, n, h, w = x_cnhw.shape
    cout, k_dim = w2d.shape
    ho = (h + 2 * pad - KW) // stride + 1
    wo = (w + 2 * pad - KW) // stride + 1
    nm = n * ho * wo
    tile_m, nm_pad, grid_m = _m_tiling(nm, k_dim, cout)

    # im2col in (C, N, H, W) layout -> (K, NM_pad) with batch folded into lanes.
    # Per-tap padding (instead of padding the 16x-inflated concat result) keeps
    # a single materialization of the patch matrix.
    # TODO(synk): fold this im2col into the kernel via halo'd input blocks to
    #             remove the 16x patch-matrix HBM round trip entirely.
    xb = x_cnhw.astype(jnp.bfloat16)
    xp = jnp.pad(xb, ((0, 0), (0, 0), (pad, pad), (pad, pad)))
    cols = []
    for kh in range(KW):
        for kw in range(KW):
            sl = lax.slice(
                xp, (0, 0, kh, kw),
                (c, n, kh + stride * (ho - 1) + 1, kw + stride * (wo - 1) + 1),
                (1, 1, stride, stride)).reshape(c, nm)
            if nm_pad != nm:
                sl = jnp.pad(sl, ((0, 0), (0, nm_pad - nm)))
            cols.append(sl)
    patches = jnp.concatenate(cols, axis=0)            # (K, NM_pad) bf16

    in_specs = [
        pl.BlockSpec((k_dim, tile_m), lambda j: (0, j)),   # patches streamed over M
        pl.BlockSpec((cout, k_dim), lambda j: (0, 0)),     # weights VMEM-resident
        pl.BlockSpec((cout, 1), lambda j: (0, 0)),         # bias resident
    ]
    meta = dict(n=n, ho=ho, wo=wo, nm=nm, nm_pad=nm_pad,
                tile_m=tile_m, grid_m=grid_m)

    if with_stats:
        out, stats = pl.pallas_call(
            _conv_stats_kernel,
            out_shape=(jax.ShapeDtypeStruct((cout, nm_pad), out_dtype),
                       jax.ShapeDtypeStruct((grid_m, cout, 2), jnp.float32)),
            grid=(grid_m,),
            in_specs=in_specs,
            out_specs=(pl.BlockSpec((cout, tile_m), lambda j: (0, j)),
                       pl.BlockSpec((None, cout, 2), lambda j: (j, 0, 0))),
            compiler_params=COMPILER_PARAMS,
        )(patches, w2d, b2)
        return out, jnp.sum(stats, axis=0), meta            # stats: (Cout, 2)

    out = pl.pallas_call(
        functools.partial(_conv_act_kernel, act=act),
        out_shape=jax.ShapeDtypeStruct((cout, nm_pad), out_dtype),
        grid=(grid_m,),
        in_specs=in_specs,
        out_specs=pl.BlockSpec((cout, tile_m), lambda j: (0, j)),
        compiler_params=COMPILER_PARAMS,
    )(patches, w2d, b2)
    return out, None, meta


def _unflatten(y_flat, meta):
    """(C, NM_pad) -> (C, N, Ho, Wo), dropping lane padding."""
    c = y_flat.shape[0]
    return y_flat[:, :meta["nm"]].reshape(c, meta["n"], meta["ho"], meta["wo"])


# ---------------------------------------------------- batchnorm + leakyrelu ---

def _bn_fold(stats, bias, gamma, beta, nm, nm_pad):
    """Fold the fused conv stats into per-channel BN scale/shift.

    Zero-padded patch columns yield y == bias exactly, so their contribution to
    the sums is removed analytically (exact).  Train-mode (biased) variance,
    matching nn.BatchNorm2d normalization during training.
    """
    npad = jnp.float32(nm_pad - nm)
    s1 = stats[:, 0] - npad * bias
    s2 = stats[:, 1] - npad * bias * bias
    cnt = jnp.float32(nm)
    mean = s1 / cnt
    var = jnp.maximum(s2 / cnt - mean * mean, 0.0)
    scale = gamma * lax.rsqrt(var + BN_EPS)
    shift = beta - mean * scale
    return scale, shift


def bn_lrelu_apply_pallas(y_flat, scale, shift, meta):
    """y = x*scale + shift, LeakyReLU(0.2); lane-dense over the fused N*M axis."""
    c, nm_pad = y_flat.shape
    tile_m, grid_m = meta["tile_m"], meta["grid_m"]
    return pl.pallas_call(
        _bn_apply_kernel,
        out_shape=jax.ShapeDtypeStruct((c, nm_pad), jnp.float32),
        grid=(grid_m,),
        in_specs=[
            pl.BlockSpec((c, tile_m), lambda j: (0, j)),
            pl.BlockSpec((c, 1), lambda j: (0, 0)),
            pl.BlockSpec((c, 1), lambda j: (0, 0)),
        ],
        out_specs=pl.BlockSpec((c, tile_m), lambda j: (0, j)),
        compiler_params=COMPILER_PARAMS,
    )(y_flat, scale.reshape(c, 1), shift.reshape(c, 1))


# ------------------------------------------------------------------ avgpool ---

def avgpool3s2(x_nchw):
    """AvgPool2d(3, stride=2, padding=1, count_include_pad=False), NCHW.

    Kept as lax.reduce_window per the perf review: the previous Pallas version
    materialized a 9x window-tap tensor in HBM for a purely memory-bound op;
    XLA's fused reduce_window reads the input once.
    """
    win, strd = (1, 1, 3, 3), (1, 1, 2, 2)
    padc = [(0, 0), (0, 0), (1, 1), (1, 1)]
    s = lax.reduce_window(x_nchw, jnp.float32(0), lax.add, win, strd, padc)
    cnt = lax.reduce_window(jnp.ones((1, 1) + x_nchw.shape[2:], jnp.float32),
                            jnp.float32(0), lax.add, win, strd, padc)
    return s / cnt


# -------------------------------------------------------------------- model ---

def _channel_schedule(input_nc, ndf, n_layers):
    nfs = [input_nc, ndf]
    nf = ndf
    for _ in range(1, n_layers):
        nf = min(nf * 2, 512)
        nfs.append(nf)
    nf = min(nf * 2, 512)
    nfs.append(nf)
    nfs.append(1)
    return nfs  # length n_layers + 3


def init_params(key, input_nc, ndf, n_layers, num_D):
    nfs = _channel_schedule(input_nc, ndf, n_layers)
    params = []
    for _ in range(num_D):
        conv_w, conv_b, bn_g, bn_b = [], [], [], []
        for layer in range(n_layers + 2):
            cin, cout = nfs[layer], nfs[layer + 1]
            key, k1, k2 = jax.random.split(key, 3)
            conv_w.append(0.1 * jax.random.normal(k1, (cout, cin, KW, KW), jnp.float32))
            conv_b.append(0.1 * jax.random.normal(k2, (cout,), jnp.float32))
            if 1 <= layer <= n_layers:  # layers with BatchNorm
                key, k3, k4 = jax.random.split(key, 3)
                bn_g.append(1.0 + 0.1 * jax.random.normal(k3, (cout,), jnp.float32))
                bn_b.append(0.1 * jax.random.normal(k4, (cout,), jnp.float32))
        params.append(dict(conv_w=conv_w, conv_b=conv_b, bn_g=bn_g, bn_b=bn_b))
    return params


def prepare_params(params):
    """Hoist weight re-layout / dtype casts out of the per-layer call path.

    (Cout, Cin, kh, kw) -> (Cout, kh*kw*Cin) bf16, matching the im2col K ordering.
    """
    prepped = []
    for p in params:
        w2d = [jnp.transpose(w, (0, 2, 3, 1)).reshape(w.shape[0], -1)
               .astype(jnp.bfloat16) for w in p["conv_w"]]
        b2 = [b.reshape(-1, 1).astype(jnp.float32) for b in p["conv_b"]]
        prepped.append(dict(
            w2d=w2d, b2=b2,
            bn_g=[g.astype(jnp.float32) for g in p["bn_g"]],
            bn_b=[b.astype(jnp.float32) for b in p["bn_b"]]))
    return prepped


def single_d_forward(p, x_cnhw, n_layers):
    feats = []
    # L0: Conv(s2) + LeakyReLU fused, f32 (returned feature + next-layer input).
    y, _, meta = conv2d_pallas(x_cnhw, p["w2d"][0], p["b2"][0], stride=2, pad=2,
                               act="lrelu", out_dtype=jnp.float32, with_stats=False)
    h = _unflatten(y, meta)
    feats.append(h)
    for layer in range(1, n_layers + 1):
        stride = 2 if layer < n_layers else 1
        # Conv with fused BN partial statistics.  The raw pre-BN activation is
        # internal-only -> stored bf16 at the HBM boundary (stats stay f32).
        y, stats, meta = conv2d_pallas(h, p["w2d"][layer], p["b2"][layer],
                                       stride=stride, pad=2, act="none",
                                       out_dtype=jnp.bfloat16, with_stats=True)
        scale, shift = _bn_fold(stats, p["b2"][layer][:, 0],
                                p["bn_g"][layer - 1], p["bn_b"][layer - 1],
                                meta["nm"], meta["nm_pad"])
        h_flat = bn_lrelu_apply_pallas(y, scale, shift, meta)
        h = _unflatten(h_flat, meta)
        feats.append(h)
    y, _, meta = conv2d_pallas(h, p["w2d"][n_layers + 1], p["b2"][n_layers + 1],
                               stride=1, pad=2, act="none",
                               out_dtype=jnp.float32, with_stats=False)
    feats.append(_unflatten(y, meta))
    # Sigmoid (model5, use_sigmoid=True) intentionally NOT applied: the PyTorch
    # forward never runs it.
    return feats


def multiscale_discriminator_forward(prepped, x_nchw, n_layers=3):
    num_D = len(prepped)
    x = x_nchw.astype(jnp.float32)
    result = []
    for i in range(num_D):
        p = prepped[num_D - 1 - i]
        x_cnhw = jnp.transpose(x, (1, 0, 2, 3))      # internal (C, N, H, W) layout
        feats = single_d_forward(p, x_cnhw, n_layers)
        result.append([jnp.transpose(f, (1, 0, 2, 3)) for f in feats])  # back to NCHW
        if i != num_D - 1:
            x = avgpool3s2(x)
    return result


# -------------------------------------------- pure-JAX reference (for check) --

def _lrelu(x):
    return jnp.where(x > 0, x, LRELU_SLOPE * x)


def _conv_ref(x, w, b, stride, pad):
    y = lax.conv_general_dilated(
        x.astype(jnp.bfloat16), w.astype(jnp.bfloat16),
        window_strides=(stride, stride), padding=[(pad, pad), (pad, pad)],
        dimension_numbers=("NCHW", "OIHW", "NCHW"),
        preferred_element_type=jnp.float32)
    return y + b.reshape(1, -1, 1, 1)


def _bn_lrelu_ref(x, gamma, beta):
    mu = jnp.mean(x, axis=(0, 2, 3), keepdims=True)
    var = jnp.mean((x - mu) ** 2, axis=(0, 2, 3), keepdims=True)
    y = (x - mu) * lax.rsqrt(var + BN_EPS)
    y = y * gamma.reshape(1, -1, 1, 1) + beta.reshape(1, -1, 1, 1)
    return _lrelu(y)


def multiscale_ref(params, x, n_layers=3):
    num_D = len(params)
    xi = x.astype(jnp.float32)
    result = []
    for i in range(num_D):
        p = params[num_D - 1 - i]
        feats = []
        h = _lrelu(_conv_ref(xi, p["conv_w"][0], p["conv_b"][0], 2, 2))
        feats.append(h)
        for layer in range(1, n_layers + 1):
            stride = 2 if layer < n_layers else 1
            h = _conv_ref(h, p["conv_w"][layer], p["conv_b"][layer], stride, 2)
            h = _bn_lrelu_ref(h, p["bn_g"][layer - 1], p["bn_b"][layer - 1])
            feats.append(h)
        h = _conv_ref(h, p["conv_w"][n_layers + 1], p["conv_b"][n_layers + 1], 1, 2)
        feats.append(h)
        result.append(feats)
        if i != num_D - 1:
            xi = avgpool3s2(xi)
    return result


# --------------------------------------------------------------------- main ---

if __name__ == "__main__":
    key = jax.random.PRNGKey(0)
    k_in, k_par = jax.random.split(key)

    N, C, H, W = 2, 4, 16, 16           # small synthetic shapes
    NDF, NLAYERS, NUM_D = 8, 3, 3

    x = jax.random.normal(k_in, (N, C, H, W), jnp.float32)
    params = init_params(k_par, input_nc=C, ndf=NDF, n_layers=NLAYERS, num_D=NUM_D)
    prepped = prepare_params(params)

    fwd = jax.jit(functools.partial(multiscale_discriminator_forward,
                                    n_layers=NLAYERS))
    out = fwd(prepped, x)
    out = jax.block_until_ready(out)

    # shape sanity: num_D scales, n_layers+2 feature maps each
    assert len(out) == NUM_D
    assert all(len(scale) == NLAYERS + 2 for scale in out)
    assert all(f.shape[0] == N for scale in out for f in scale)

    # structural check vs a pure-JAX reference (bf16 matmul inputs in both
    # paths; tolerance covers bf16 rounding of the internal pre-BN carry and
    # accumulation-order differences)
    ref = multiscale_ref(params, x, n_layers=NLAYERS)
    for scale_out, scale_ref in zip(out, ref):
        for a, b in zip(scale_out, scale_ref):
            assert a.shape == b.shape, (a.shape, b.shape)
            assert bool(jnp.allclose(a, b, rtol=0.2, atol=0.2)), (
                "mismatch: max|diff|=%f" % float(jnp.max(jnp.abs(a - b))))

    print("KERNEL_OK")
</pallas_src>

<mosaic_0001>
module attributes {stable_mosaic.version = 11 : i64} {
  func.func @_conv_act_kernel(%arg0: i32, %arg1: memref<64x256xbf16, #tpu.memory_space<vmem>>, %arg2: memref<8x64xbf16, #tpu.memory_space<vmem>>, %arg3: memref<8x1xf32, #tpu.memory_space<vmem>>, %arg4: memref<8x256xf32, #tpu.memory_space<vmem>>) attributes {dimension_semantics = [#tpu.dimension_semantics<parallel>], iteration_bounds = array<i64: 1>, scalar_prefetch = 0 : i64, scratch_operands = 0 : i64, tpu.core_type = #tpu.core_type<tc>, window_params = [{transform_indices = @transform_0, window_bounds = array<i64: 64, 256>}, {pipeline_mode = #tpu.pipeline_mode<synchronous>, transform_indices = @transform_1, window_bounds = array<i64: 8, 64>}, {pipeline_mode = #tpu.pipeline_mode<synchronous>, transform_indices = @transform_2, window_bounds = array<i64: 8, 1>}, {transform_indices = @transform_3, window_bounds = array<i64: 8, 256>}]} {
    %c0 = arith.constant 0 : index
    %c0_0 = arith.constant 0 : index
    %0 = vector.load %arg2[%c0, %c0_0] : memref<8x64xbf16, #tpu.memory_space<vmem>>, vector<8x64xbf16>
    %c0_1 = arith.constant 0 : index
    %c0_2 = arith.constant 0 : index
    %1 = vector.load %arg1[%c0_1, %c0_2] : memref<64x256xbf16, #tpu.memory_space<vmem>>, vector<64x256xbf16>
    %cst = arith.constant dense<0.000000e+00> : vector<8x256xf32>
    %2 = tpu.matmul %0, %1, %cst {dimension_numbers = #tpu.dot_dimension_numbers<[1], [0], [0], [1], [0, 0, 1, 1], [], []>} : vector<8x64xbf16>, vector<64x256xbf16>, vector<8x256xf32> -> vector<8x256xf32>
    %c0_3 = arith.constant 0 : index
    %c0_4 = arith.constant 0 : index
    %3 = vector.load %arg3[%c0_3, %c0_4] : memref<8x1xf32, #tpu.memory_space<vmem>>, vector<8x1xf32>
    %4 = vector.broadcast %3 : vector<8x1xf32> to vector<8x256xf32>
    %5 = arith.addf %2, %4 : vector<8x256xf32>
    %cst_5 = arith.constant 0.000000e+00 : f32
    %6 = vector.broadcast %cst_5 : f32 to vector<8x256xf32>
    %7 = arith.cmpf ogt, %5, %6 : vector<8x256xf32>
    %cst_6 = arith.constant 2.000000e-01 : f32
    %8 = vector.broadcast %cst_6 : f32 to vector<8x256xf32>
    %9 = arith.mulf %8, %5 : vector<8x256xf32>
    %10 = arith.select %7, %5, %9 : vector<8x256xi1>, vector<8x256xf32>
    %c0_7 = arith.constant 0 : index
    %c0_8 = arith.constant 0 : index
    %11 = vector.load %arg4[%c0_7, %c0_8] : memref<8x256xf32, #tpu.memory_space<vmem>>, vector<8x256xf32>
    tpu.vector_store %arg4[%c0_7, %c0_8], %10 {strides = array<i32>} : memref<8x256xf32, #tpu.memory_space<vmem>>, vector<8x256xf32>,
    return
  }
  func.func @transform_0(%arg0: i32) -> (i32, i32) {
    %c0_i32 = arith.constant 0 : i32
    %c0_i32_0 = arith.constant 0 : i32
    return %c0_i32, %arg0 : i32, i32
  }
  func.func @transform_1(%arg0: i32) -> (i32, i32) {
    %c0_i32 = arith.constant 0 : i32
    %c0_i32_0 = arith.constant 0 : i32
    %c0_i32_1 = arith.constant 0 : i32
    return %c0_i32, %c0_i32_0 : i32, i32
  }
  func.func @transform_2(%arg0: i32) -> (i32, i32) {
    %c0_i32 = arith.constant 0 : i32
    %c0_i32_0 = arith.constant 0 : i32
    %c0_i32_1 = arith.constant 0 : i32
    return %c0_i32, %c0_i32_0 : i32, i32
  }
  func.func @transform_3(%arg0: i32) -> (i32, i32) {
    %c0_i32 = arith.constant 0 : i32
    %c0_i32_0 = arith.constant 0 : i32
    return %c0_i32, %arg0 : i32, i32
  }
}

module attributes {stable_mosaic.version = 11 : i64} {
  func.func @_conv_stats_kernel(%arg0: i32, %arg1: memref<128x128xbf16, #tpu.memory_space<vmem>>, %arg2: memref<16x128xbf16, #tpu.memory_space<vmem>>, %arg3: memref<16x1xf32, #tpu.memory_space<vmem>>, %arg4: memref<16x128xbf16, #tpu.memory_space<vmem>>, %arg5: memref<1x16x2xf32, #tpu.memory_space<vmem>>) attributes {dimension_semantics = [#tpu.dimension_semantics<parallel>], iteration_bounds = array<i64: 1>, scalar_prefetch = 0 : i64, scratch_operands = 0 : i64, tpu.core_type = #tpu.core_type<tc>, window_params = [{transform_indices = @transform_0, window_bounds = array<i64: 128, 128>}, {pipeline_mode = #tpu.pipeline_mode<synchronous>, transform_indices = @transform_1, window_bounds = array<i64: 16, 128>}, {pipeline_mode = #tpu.pipeline_mode<synchronous>, transform_indices = @transform_2, window_bounds = array<i64: 16, 1>}, {transform_indices = @transform_3, window_bounds = array<i64: 16, 128>}, {transform_indices = @transform_4, window_bounds = array<i64: 1, 16, 2>}]} {
    %c0 = arith.constant 0 : index
    %c0_0 = arith.constant 0 : index
    %0 = vector.load %arg2[%c0, %c0_0] : memref<16x128xbf16, #tpu.memory_space<vmem>>, vector<16x128xbf16>
    %c0_1 = arith.constant 0 : index
    %c0_2 = arith.constant 0 : index
    %1 = vector.load %arg1[%c0_1, %c0_2] : memref<128x128xbf16, #tpu.memory_space<vmem>>, vector<128x128xbf16>
    %cst = arith.constant dense<0.000000e+00> : vector<16x128xf32>
    %2 = tpu.matmul %0, %1, %cst {dimension_numbers = #tpu.dot_dimension_numbers<[1], [0], [0], [1], [0, 0, 1, 1], [], []>} : vector<16x128xbf16>, vector<128x128xbf16>, vector<16x128xf32> -> vector<16x128xf32>
    %c0_3 = arith.constant 0 : index
    %c0_4 = arith.constant 0 : index
    %3 = vector.load %arg3[%c0_3, %c0_4] : memref<16x1xf32, #tpu.memory_space<vmem>>, vector<16x1xf32>
    %4 = vector.broadcast %3 : vector<16x1xf32> to vector<16x128xf32>
    %5 = arith.addf %2, %4 : vector<16x128xf32>
    %cst_5 = arith.constant dense<0.000000e+00> : vector<16xf32>
    %6 = vector.multi_reduction <add>, %5, %cst_5 [1] : vector<16x128xf32> to vector<16xf32>
    %7 = vector.shape_cast %6 : vector<16xf32> to vector<16x1xf32>
    %c0_6 = arith.constant 0 : index
    %c0_7 = arith.constant 0 : index
    %c0_8 = arith.constant 0 : index
    %8 = vector.load %arg5[%c0_6, %c0_7, %c0_8] : memref<1x16x2xf32, #tpu.memory_space<vmem>>, vector<1x16x1xf32>
    %9 = vector.shape_cast %8 : vector<1x16x1xf32> to vector<16x1xf32>
    %10 = vector.shape_cast %7 : vector<16x1xf32> to vector<1x16x1xf32>
    tpu.vector_store %arg5[%c0_6, %c0_7, %c0_8], %10 {strides = array<i32>} : memref<1x16x2xf32, #tpu.memory_space<vmem>>, vector<1x16x1xf32>,
    %11 = arith.mulf %5, %5 : vector<16x128xf32>
    %cst_9 = arith.constant dense<0.000000e+00> : vector<16xf32>
    %12 = vector.multi_reduction <add>, %11, %cst_9 [1] : vector<16x128xf32> to vector<16xf32>
    %13 = vector.shape_cast %12 : vector<16xf32> to vector<16x1xf32>
    %c0_10 = arith.constant 0 : index
    %c0_11 = arith.constant 0 : index
    %c1 = arith.constant 1 : index
    %14 = vector.load %arg5[%c0_10, %c0_11, %c1] : memref<1x16x2xf32, #tpu.memory_space<vmem>>, vector<1x16x1xf32>
    %15 = vector.shape_cast %14 : vector<1x16x1xf32> to vector<16x1xf32>
    %16 = vector.shape_cast %13 : vector<16x1xf32> to vector<1x16x1xf32>
    tpu.vector_store %arg5[%c0_10, %c0_11, %c1], %16 {strides = array<i32>} : memref<1x16x2xf32, #tpu.memory_space<vmem>>, vector<1x16x1xf32>,
    %17 = arith.truncf %5 : vector<16x128xf32> to vector<16x128xbf16>
    %c0_12 = arith.constant 0 : index
    %c0_13 = arith.constant 0 : index
    %18 = vector.load %arg4[%c0_12, %c0_13] : memref<16x128xbf16, #tpu.memory_space<vmem>>, vector<16x128xbf16>
    tpu.vector_store %arg4[%c0_12, %c0_13], %17 {strides = array<i32>} : memref<16x128xbf16, #tpu.memory_space<vmem>>, vector<16x128xbf16>,
    return
  }
  func.func @transform_0(%arg0: i32) -> (i32, i32) {
    %c0_i32 = arith.constant 0 : i32
    %c0_i32_0 = arith.constant 0 : i32
    return %c0_i32, %arg0 : i32, i32
  }
  func.func @transform_1(%arg0: i32) -> (i32, i32) {
    %c0_i32 = arith.constant 0 : i32
    %c0_i32_0 = arith.constant 0 : i32
    %c0_i32_1 = arith.constant 0 : i32
    return %c0_i32, %c0_i32_0 : i32, i32
  }
  func.func @transform_2(%arg0: i32) -> (i32, i32) {
    %c0_i32 = arith.constant 0 : i32
    %c0_i32_0 = arith.constant 0 : i32
    %c0_i32_1 = arith.constant 0 : i32
    return %c0_i32, %c0_i32_0 : i32, i32
  }
  func.func @transform_3(%arg0: i32) -> (i32, i32) {
    %c0_i32 = arith.constant 0 : i32
    %c0_i32_0 = arith.constant 0 : i32
    return %c0_i32, %arg0 : i32, i32
  }
  func.func @transform_4(%arg0: i32) -> (i32, i32, i32) {
    %c0_i32 = arith.constant 0 : i32
    %c0_i32_0 = arith.constant 0 : i32
    %c0_i32_1 = arith.constant 0 : i32
    return %arg0, %c0_i32, %c0_i32_0 : i32, i32, i32
  }
}

module attributes {stable_mosaic.version = 11 : i64} {
  func.func @_bn_apply_kernel(%arg0: i32, %arg1: memref<16x128xbf16, #tpu.memory_space<vmem>>, %arg2: memref<16x1xf32, #tpu.memory_space<vmem>>, %arg3: memref<16x1xf32, #tpu.memory_space<vmem>>, %arg4: memref<16x128xf32, #tpu.memory_space<vmem>>) attributes {dimension_semantics = [#tpu.dimension_semantics<parallel>], iteration_bounds = array<i64: 1>, scalar_prefetch = 0 : i64, scratch_operands = 0 : i64, tpu.core_type = #tpu.core_type<tc>, window_params = [{transform_indices = @transform_0, window_bounds = array<i64: 16, 128>}, {pipeline_mode = #tpu.pipeline_mode<synchronous>, transform_indices = @transform_1, window_bounds = array<i64: 16, 1>}, {pipeline_mode = #tpu.pipeline_mode<synchronous>, transform_indices = @transform_2, window_bounds = array<i64: 16, 1>}, {transform_indices = @transform_3, window_bounds = array<i64: 16, 128>}]} {
    %c0 = arith.constant 0 : index
    %c0_0 = arith.constant 0 : index
    %0 = vector.load %arg1[%c0, %c0_0] : memref<16x128xbf16, #tpu.memory_space<vmem>>, vector<16x128xbf16>
    %1 = arith.extf %0 : vector<16x128xbf16> to vector<16x128xf32>
    %c0_1 = arith.constant 0 : index
    %c0_2 = arith.constant 0 : index
    %2 = vector.load %arg2[%c0_1, %c0_2] : memref<16x1xf32, #tpu.memory_space<vmem>>, vector<16x1xf32>
    %3 = vector.broadcast %2 : vector<16x1xf32> to vector<16x128xf32>
    %4 = arith.mulf %1, %3 : vector<16x128xf32>
    %c0_3 = arith.constant 0 : index
    %c0_4 = arith.constant 0 : index
    %5 = vector.load %arg3[%c0_3, %c0_4] : memref<16x1xf32, #tpu.memory_space<vmem>>, vector<16x1xf32>
    %6 = vector.broadcast %5 : vector<16x1xf32> to vector<16x128xf32>
    %7 = arith.addf %4, %6 : vector<16x128xf32>
    %cst = arith.constant 0.000000e+00 : f32
    %8 = vector.broadcast %cst : f32 to vector<16x128xf32>
    %9 = arith.cmpf ogt, %7, %8 : vector<16x128xf32>
    %cst_5 = arith.constant 2.000000e-01 : f32
    %10 = vector.broadcast %cst_5 : f32 to vector<16x128xf32>
    %11 = arith.mulf %10, %7 : vector<16x128xf32>
    %12 = arith.select %9, %7, %11 : vector<16x128xi1>, vector<16x128xf32>
    %c0_6 = arith.constant 0 : index
    %c0_7 = arith.constant 0 : index
    %13 = vector.load %arg4[%c0_6, %c0_7] : memref<16x128xf32, #tpu.memory_space<vmem>>, vector<16x128xf32>
    tpu.vector_store %arg4[%c0_6, %c0_7], %12 {strides = array<i32>} : memref<16x128xf32, #tpu.memory_space<vmem>>, vector<16x128xf32>,
    return
  }
  func.func @transform_0(%arg0: i32) -> (i32, i32) {
    %c0_i32 = arith.constant 0 : i32
    %c0_i32_0 = arith.constant 0 : i32
    return %c0_i32, %arg0 : i32, i32
  }
  func.func @transform_1(%arg0: i32) -> (i32, i32) {
    %c0_i32 = arith.constant 0 : i32
    %c0_i32_0 = arith.constant 0 : i32
    %c0_i32_1 = arith.constant 0 : i32
    return %c0_i32, %c0_i32_0 : i32, i32
  }
  func.func @transform_2(%arg0: i32) -> (i32, i32) {
    %c0_i32 = arith.constant 0 : i32
    %c0_i32_0 = arith.constant 0 : i32
    %c0_i32_1 = arith.constant 0 : i32
    return %c0_i32, %c0_i32_0 : i32, i32
  }
  func.func @transform_3(%arg0: i32) -> (i32, i32) {
    %c0_i32 = arith.constant 0 : i32
    %c0_i32_0 = arith.constant 0 : i32
    return %c0_i32, %arg0 : i32, i32
  }
}

module attributes {stable_mosaic.version = 11 : i64} {
  func.func @_conv_stats_kernel(%arg0: i32, %arg1: memref<256x128xbf16, #tpu.memory_space<vmem>>, %arg2: memref<32x256xbf16, #tpu.memory_space<vmem>>, %arg3: memref<32x1xf32, #tpu.memory_space<vmem>>, %arg4: memref<32x128xbf16, #tpu.memory_space<vmem>>, %arg5: memref<1x32x2xf32, #tpu.memory_space<vmem>>) attributes {dimension_semantics = [#tpu.dimension_semantics<parallel>], iteration_bounds = array<i64: 1>, scalar_prefetch = 0 : i64, scratch_operands = 0 : i64, tpu.core_type = #tpu.core_type<tc>, window_params = [{transform_indices = @transform_0, window_bounds = array<i64: 256, 128>}, {pipeline_mode = #tpu.pipeline_mode<synchronous>, transform_indices = @transform_1, window_bounds = array<i64: 32, 256>}, {pipeline_mode = #tpu.pipeline_mode<synchronous>, transform_indices = @transform_2, window_bounds = array<i64: 32, 1>}, {transform_indices = @transform_3, window_bounds = array<i64: 32, 128>}, {transform_indices = @transform_4, window_bounds = array<i64: 1, 32, 2>}]} {
    %c0 = arith.constant 0 : index
    %c0_0 = arith.constant 0 : index
    %0 = vector.load %arg2[%c0, %c0_0] : memref<32x256xbf16, #tpu.memory_space<vmem>>, vector<32x256xbf16>
    %c0_1 = arith.constant 0 : index
    %c0_2 = arith.constant 0 : index
    %1 = vector.load %arg1[%c0_1, %c0_2] : memref<256x128xbf16, #tpu.memory_space<vmem>>, vector<256x128xbf16>
    %cst = arith.constant dense<0.000000e+00> : vector<32x128xf32>
    %2 = tpu.matmul %0, %1, %cst {dimension_numbers = #tpu.dot_dimension_numbers<[1], [0], [0], [1], [0, 0, 1, 1], [], []>} : vector<32x256xbf16>, vector<256x128xbf16>, vector<32x128xf32> -> vector<32x128xf32>
    %c0_3 = arith.constant 0 : index
    %c0_4 = arith.constant 0 : index
    %3 = vector.load %arg3[%c0_3, %c0_4] : memref<32x1xf32, #tpu.memory_space<vmem>>, vector<32x1xf32>
    %4 = vector.broadcast %3 : vector<32x1xf32> to vector<32x128xf32>
    %5 = arith.addf %2, %4 : vector<32x128xf32>
    %cst_5 = arith.constant dense<0.000000e+00> : vector<32xf32>
    %6 = vector.multi_reduction <add>, %5, %cst_5 [1] : vector<32x128xf32> to vector<32xf32>
    %7 = vector.shape_cast %6 : vector<32xf32> to vector<32x1xf32>
    %c0_6 = arith.constant 0 : index
    %c0_7 = arith.constant 0 : index
    %c0_8 = arith.constant 0 : index
    %8 = vector.load %arg5[%c0_6, %c0_7, %c0_8] : memref<1x32x2xf32, #tpu.memory_space<vmem>>, vector<1x32x1xf32>
    %9 = vector.shape_cast %8 : vector<1x32x1xf32> to vector<32x1xf32>
    %10 = vector.shape_cast %7 : vector<32x1xf32> to vector<1x32x1xf32>
    tpu.vector_store %arg5[%c0_6, %c0_7, %c0_8], %10 {strides = array<i32>} : memref<1x32x2xf32, #tpu.memory_space<vmem>>, vector<1x32x1xf32>,
    %11 = arith.mulf %5, %5 : vector<32x128xf32>
    %cst_9 = arith.constant dense<0.000000e+00> : vector<32xf32>
    %12 = vector.multi_reduction <add>, %11, %cst_9 [1] : vector<32x128xf32> to vector<32xf32>
    %13 = vector.shape_cast %12 : vector<32xf32> to vector<32x1xf32>
    %c0_10 = arith.constant 0 : index
    %c0_11 = arith.constant 0 : index
    %c1 = arith.constant 1 : index
    %14 = vector.load %arg5[%c0_10, %c0_11, %c1] : memref<1x32x2xf32, #tpu.memory_space<vmem>>, vector<1x32x1xf32>
    %15 = vector.shape_cast %14 : vector<1x32x1xf32> to vector<32x1xf32>
    %16 = vector.shape_cast %13 : vector<32x1xf32> to vector<1x32x1xf32>
    tpu.vector_store %arg5[%c0_10, %c0_11, %c1], %16 {strides = array<i32>} : memref<1x32x2xf32, #tpu.memory_space<vmem>>, vector<1x32x1xf32>,
    %17 = arith.truncf %5 : vector<32x128xf32> to vector<32x128xbf16>
    %c0_12 = arith.constant 0 : index
    %c0_13 = arith.constant 0 : index
    %18 = vector.load %arg4[%c0_12, %c0_13] : memref<32x128xbf16, #tpu.memory_space<vmem>>, vector<32x128xbf16>
    tpu.vector_store %arg4[%c0_12, %c0_13], %17 {strides = array<i32>} : memref<32x128xbf16, #tpu.memory_space<vmem>>, vector<32x128xbf16>,
    return
  }
  func.func @transform_0(%arg0: i32) -> (i32, i32) {
    %c0_i32 = arith.constant 0 : i32
    %c0_i32_0 = arith.constant 0 : i32
    return %c0_i32, %arg0 : i32, i32
  }
  func.func @transform_1(%arg0: i32) -> (i32, i32) {
    %c0_i32 = arith.constant 0 : i32
    %c0_i32_0 = arith.constant 0 : i32
    %c0_i32_1 = arith.constant 0 : i32
    return %c0_i32, %c0_i32_0 : i32, i32
  }
  func.func @transform_2(%arg0: i32) -> (i32, i32) {
    %c0_i32 = arith.constant 0 : i32
    %c0_i32_0 = arith.constant 0 : i32
    %c0_i32_1 = arith.constant 0 : i32
    return %c0_i32, %c0_i32_0 : i32, i32
  }
  func.func @transform_3(%arg0: i32) -> (i32, i32) {
    %c0_i32 = arith.constant 0 : i32
    %c0_i32_0 = arith.constant 0 : i32
    return %c0_i32, %arg0 : i32, i32
  }
  func.func @transform_4(%arg0: i32) -> (i32, i32, i32) {
    %c0_i32 = arith.constant 0 : i32
    %c0_i32_0 = arith.constant 0 : i32
    %c0_i32_1 = arith.constant 0 : i32
    return %arg0, %c0_i32, %c0_i32_0 : i32, i32, i32
  }
}

module attributes {stable_mosaic.version = 11 : i64} {
  func.func @_bn_apply_kernel(%arg0: i32, %arg1: memref<32x128xbf16, #tpu.memory_space<vmem>>, %arg2: memref<32x1xf32, #tpu.memory_space<vmem>>, %arg3: memref<32x1xf32, #tpu.memory_space<vmem>>, %arg4: memref<32x128xf32, #tpu.memory_space<vmem>>) attributes {dimension_semantics = [#tpu.dimension_semantics<parallel>], iteration_bounds = array<i64: 1>, scalar_prefetch = 0 : i64, scratch_operands = 0 : i64, tpu.core_type = #tpu.core_type<tc>, window_params = [{transform_indices = @transform_0, window_bounds = array<i64: 32, 128>}, {pipeline_mode = #tpu.pipeline_mode<synchronous>, transform_indices = @transform_1, window_bounds = array<i64: 32, 1>}, {pipeline_mode = #tpu.pipeline_mode<synchronous>, transform_indices = @transform_2, window_bounds = array<i64: 32, 1>}, {transform_indices = @transform_3, window_bounds = array<i64: 32, 128>}]} {
    %c0 = arith.constant 0 : index
    %c0_0 = arith.constant 0 : index
    %0 = vector.load %arg1[%c0, %c0_0] : memref<32x128xbf16, #tpu.memory_space<vmem>>, vector<32x128xbf16>
    %1 = arith.extf %0 : vector<32x128xbf16> to vector<32x128xf32>
    %c0_1 = arith.constant 0 : index
    %c0_2 = arith.constant 0 : index
    %2 = vector.load %arg2[%c0_1, %c0_2] : memref<32x1xf32, #tpu.memory_space<vmem>>, vector<32x1xf32>
    %3 = vector.broadcast %2 : vector<32x1xf32> to vector<32x128xf32>
    %4 = arith.mulf %1, %3 : vector<32x128xf32>
    %c0_3 = arith.constant 0 : index
    %c0_4 = arith.constant 0 : index
    %5 = vector.load %arg3[%c0_3, %c0_4] : memref<32x1xf32, #tpu.memory_space<vmem>>, vector<32x1xf32>
    %6 = vector.broadcast %5 : vector<32x1xf32> to vector<32x128xf32>
    %7 = arith.addf %4, %6 : vector<32x128xf32>
    %cst = arith.constant 0.000000e+00 : f32
    %8 = vector.broadcast %cst : f32 to vector<32x128xf32>
    %9 = arith.cmpf ogt, %7, %8 : vector<32x128xf32>
    %cst_5 = arith.constant 2.000000e-01 : f32
    %10 = vector.broadcast %cst_5 : f32 to vector<32x128xf32>
    %11 = arith.mulf %10, %7 : vector<32x128xf32>
    %12 = arith.select %9, %7, %11 : vector<32x128xi1>, vector<32x128xf32>
    %c0_6 = arith.constant 0 : index
    %c0_7 = arith.constant 0 : index
    %13 = vector.load %arg4[%c0_6, %c0_7] : memref<32x128xf32, #tpu.memory_space<vmem>>, vector<32x128xf32>
    tpu.vector_store %arg4[%c0_6, %c0_7], %12 {strides = array<i32>} : memref<32x128xf32, #tpu.memory_space<vmem>>, vector<32x128xf32>,
    return
  }
  func.func @transform_0(%arg0: i32) -> (i32, i32) {
    %c0_i32 = arith.constant 0 : i32
    %c0_i32_0 = arith.constant 0 : i32
    return %c0_i32, %arg0 : i32, i32
  }
  func.func @transform_1(%arg0: i32) -> (i32, i32) {
    %c0_i32 = arith.constant 0 : i32
    %c0_i32_0 = arith.constant 0 : i32
    %c0_i32_1 = arith.constant 0 : i32
    return %c0_i32, %c0_i32_0 : i32, i32
  }
  func.func @transform_2(%arg0: i32) -> (i32, i32) {
    %c0_i32 = arith.constant 0 : i32
    %c0_i32_0 = arith.constant 0 : i32
    %c0_i32_1 = arith.constant 0 : i32
    return %c0_i32, %c0_i32_0 : i32, i32
  }
  func.func @transform_3(%arg0: i32) -> (i32, i32) {
    %c0_i32 = arith.constant 0 : i32
    %c0_i32_0 = arith.constant 0 : i32
    return %c0_i32, %arg0 : i32, i32
  }
}

module attributes {stable_mosaic.version = 11 : i64} {
  func.func @_conv_stats_kernel(%arg0: i32, %arg1: memref<512x128xbf16, #tpu.memory_space<vmem>>, %arg2: memref<64x512xbf16, #tpu.memory_space<vmem>>, %arg3: memref<64x1xf32, #tpu.memory_space<vmem>>, %arg4: memref<64x128xbf16, #tpu.memory_space<vmem>>, %arg5: memref<1x64x2xf32, #tpu.memory_space<vmem>>) attributes {dimension_semantics = [#tpu.dimension_semantics<parallel>], iteration_bounds = array<i64: 1>, scalar_prefetch = 0 : i64, scratch_operands = 0 : i64, tpu.core_type = #tpu.core_type<tc>, window_params = [{transform_indices = @transform_0, window_bounds = array<i64: 512, 128>}, {pipeline_mode = #tpu.pipeline_mode<synchronous>, transform_indices = @transform_1, window_bounds = array<i64: 64, 512>}, {pipeline_mode = #tpu.pipeline_mode<synchronous>, transform_indices = @transform_2, window_bounds = array<i64: 64, 1>}, {transform_indices = @transform_3, window_bounds = array<i64: 64, 128>}, {transform_indices = @transform_4, window_bounds = array<i64: 1, 64, 2>}]} {
    %c0 = arith.constant 0 : index
    %c0_0 = arith.constant 0 : index
    %0 = vector.load %arg2[%c0, %c0_0] : memref<64x512xbf16, #tpu.memory_space<vmem>>, vector<64x512xbf16>
    %c0_1 = arith.constant 0 : index
    %c0_2 = arith.constant 0 : index
    %1 = vector.load %arg1[%c0_1, %c0_2] : memref<512x128xbf16, #tpu.memory_space<vmem>>, vector<512x128xbf16>
    %cst = arith.constant dense<0.000000e+00> : vector<64x128xf32>
    %2 = tpu.matmul %0, %1, %cst {dimension_numbers = #tpu.dot_dimension_numbers<[1], [0], [0], [1], [0, 0, 1, 1], [], []>} : vector<64x512xbf16>, vector<512x128xbf16>, vector<64x128xf32> -> vector<64x128xf32>
    %c0_3 = arith.constant 0 : index
    %c0_4 = arith.constant 0 : index
    %3 = vector.load %arg3[%c0_3, %c0_4] : memref<64x1xf32, #tpu.memory_space<vmem>>, vector<64x1xf32>
    %4 = vector.broadcast %3 : vector<64x1xf32> to vector<64x128xf32>
    %5 = arith.addf %2, %4 : vector<64x128xf32>
    %cst_5 = arith.constant dense<0.000000e+00> : vector<64xf32>
    %6 = vector.multi_reduction <add>, %5, %cst_5 [1] : vector<64x128xf32> to vector<64xf32>
    %7 = vector.shape_cast %6 : vector<64xf32> to vector<64x1xf32>
    %c0_6 = arith.constant 0 : index
    %c0_7 = arith.constant 0 : index
    %c0_8 = arith.constant 0 : index
    %8 = vector.load %arg5[%c0_6, %c0_7, %c0_8] : memref<1x64x2xf32, #tpu.memory_space<vmem>>, vector<1x64x1xf32>
    %9 = vector.shape_cast %8 : vector<1x64x1xf32> to vector<64x1xf32>
    %10 = vector.shape_cast %7 : vector<64x1xf32> to vector<1x64x1xf32>
    tpu.vector_store %arg5[%c0_6, %c0_7, %c0_8], %10 {strides = array<i32>} : memref<1x64x2xf32, #tpu.memory_space<vmem>>, vector<1x64x1xf32>,
    %11 = arith.mulf %5, %5 : vector<64x128xf32>
    %cst_9 = arith.constant dense<0.000000e+00> : vector<64xf32>
    %12 = vector.multi_reduction <add>, %11, %cst_9 [1] : vector<64x128xf32> to vector<64xf32>
    %13 = vector.shape_cast %12 : vector<64xf32> to vector<64x1xf32>
    %c0_10 = arith.constant 0 : index
    %c0_11 = arith.constant 0 : index
    %c1 = arith.constant 1 : index
    %14 = vector.load %arg5[%c0_10, %c0_11, %c1] : memref<1x64x2xf32, #tpu.memory_space<vmem>>, vector<1x64x1xf32>
    %15 = vector.shape_cast %14 : vector<1x64x1xf32> to vector<64x1xf32>
    %16 = vector.shape_cast %13 : vector<64x1xf32> to vector<1x64x1xf32>
    tpu.vector_store %arg5[%c0_10, %c0_11, %c1], %16 {strides = array<i32>} : memref<1x64x2xf32, #tpu.memory_space<vmem>>, vector<1x64x1xf32>,
    %17 = arith.truncf %5 : vector<64x128xf32> to vector<64x128xbf16>
    %c0_12 = arith.constant 0 : index
    %c0_13 = arith.constant 0 : index
    %18 = vector.load %arg4[%c0_12, %c0_13] : memref<64x128xbf16, #tpu.memory_space<vmem>>, vector<64x128xbf16>
    tpu.vector_store %arg4[%c0_12, %c0_13], %17 {strides = array<i32>} : memref<64x128xbf16, #tpu.memory_space<vmem>>, vector<64x128xbf16>,
    return
  }
  func.func @transform_0(%arg0: i32) -> (i32, i32) {
    %c0_i32 = arith.constant 0 : i32
    %c0_i32_0 = arith.constant 0 : i32
    return %c0_i32, %arg0 : i32, i32
  }
  func.func @transform_1(%arg0: i32) -> (i32, i32) {
    %c0_i32 = arith.constant 0 : i32
    %c0_i32_0 = arith.constant 0 : i32
    %c0_i32_1 = arith.constant 0 : i32
    return %c0_i32, %c0_i32_0 : i32, i32
  }
  func.func @transform_2(%arg0: i32) -> (i32, i32) {
    %c0_i32 = arith.constant 0 : i32
    %c0_i32_0 = arith.constant 0 : i32
    %c0_i32_1 = arith.constant 0 : i32
    return %c0_i32, %c0_i32_0 : i32, i32
  }
  func.func @transform_3(%arg0: i32) -> (i32, i32) {
    %c0_i32 = arith.constant 0 : i32
    %c0_i32_0 = arith.constant 0 : i32
    return %c0_i32, %arg0 : i32, i32
  }
  func.func @transform_4(%arg0: i32) -> (i32, i32, i32) {
    %c0_i32 = arith.constant 0 : i32
    %c0_i32_0 = arith.constant 0 : i32
    %c0_i32_1 = arith.constant 0 : i32
    return %arg0, %c0_i32, %c0_i32_0 : i32, i32, i32
  }
}

module attributes {stable_mosaic.version = 11 : i64} {
  func.func @_bn_apply_kernel(%arg0: i32, %arg1: memref<64x128xbf16, #tpu.memory_space<vmem>>, %arg2: memref<64x1xf32, #tpu.memory_space<vmem>>, %arg3: memref<64x1xf32, #tpu.memory_space<vmem>>, %arg4: memref<64x128xf32, #tpu.memory_space<vmem>>) attributes {dimension_semantics = [#tpu.dimension_semantics<parallel>], iteration_bounds = array<i64: 1>, scalar_prefetch = 0 : i64, scratch_operands = 0 : i64, tpu.core_type = #tpu.core_type<tc>, window_params = [{transform_indices = @transform_0, window_bounds = array<i64: 64, 128>}, {pipeline_mode = #tpu.pipeline_mode<synchronous>, transform_indices = @transform_1, window_bounds = array<i64: 64, 1>}, {pipeline_mode = #tpu.pipeline_mode<synchronous>, transform_indices = @transform_2, window_bounds = array<i64: 64, 1>}, {transform_indices = @transform_3, window_bounds = array<i64: 64, 128>}]} {
    %c0 = arith.constant 0 : index
    %c0_0 = arith.constant 0 : index
    %0 = vector.load %arg1[%c0, %c0_0] : memref<64x128xbf16, #tpu.memory_space<vmem>>, vector<64x128xbf16>
    %1 = arith.extf %0 : vector<64x128xbf16> to vector<64x128xf32>
    %c0_1 = arith.constant 0 : index
    %c0_2 = arith.constant 0 : index
    %2 = vector.load %arg2[%c0_1, %c0_2] : memref<64x1xf32, #tpu.memory_space<vmem>>, vector<64x1xf32>
    %3 = vector.broadcast %2 : vector<64x1xf32> to vector<64x128xf32>
    %4 = arith.mulf %1, %3 : vector<64x128xf32>
    %c0_3 = arith.constant 0 : index
    %c0_4 = arith.constant 0 : index
    %5 = vector.load %arg3[%c0_3, %c0_4] : memref<64x1xf32, #tpu.memory_space<vmem>>, vector<64x1xf32>
    %6 = vector.broadcast %5 : vector<64x1xf32> to vector<64x128xf32>
    %7 = arith.addf %4, %6 : vector<64x128xf32>
    %cst = arith.constant 0.000000e+00 : f32
    %8 = vector.broadcast %cst : f32 to vector<64x128xf32>
    %9 = arith.cmpf ogt, %7, %8 : vector<64x128xf32>
    %cst_5 = arith.constant 2.000000e-01 : f32
    %10 = vector.broadcast %cst_5 : f32 to vector<64x128xf32>
    %11 = arith.mulf %10, %7 : vector<64x128xf32>
    %12 = arith.select %9, %7, %11 : vector<64x128xi1>, vector<64x128xf32>
    %c0_6 = arith.constant 0 : index
    %c0_7 = arith.constant 0 : index
    %13 = vector.load %arg4[%c0_6, %c0_7] : memref<64x128xf32, #tpu.memory_space<vmem>>, vector<64x128xf32>
    tpu.vector_store %arg4[%c0_6, %c0_7], %12 {strides = array<i32>} : memref<64x128xf32, #tpu.memory_space<vmem>>, vector<64x128xf32>,
    return
  }
  func.func @transform_0(%arg0: i32) -> (i32, i32) {
    %c0_i32 = arith.constant 0 : i32
    %c0_i32_0 = arith.constant 0 : i32
    return %c0_i32, %arg0 : i32, i32
  }
  func.func @transform_1(%arg0: i32) -> (i32, i32) {
    %c0_i32 = arith.constant 0 : i32
    %c0_i32_0 = arith.constant 0 : i32
    %c0_i32_1 = arith.constant 0 : i32
    return %c0_i32, %c0_i32_0 : i32, i32
  }
  func.func @transform_2(%arg0: i32) -> (i32, i32) {
    %c0_i32 = arith.constant 0 : i32
    %c0_i32_0 = arith.constant 0 : i32
    %c0_i32_1 = arith.constant 0 : i32
    return %c0_i32, %c0_i32_0 : i32, i32
  }
  func.func @transform_3(%arg0: i32) -> (i32, i32) {
    %c0_i32 = arith.constant 0 : i32
    %c0_i32_0 = arith.constant 0 : i32
    return %c0_i32, %arg0 : i32, i32
  }
}

module attributes {stable_mosaic.version = 11 : i64} {
  func.func @_conv_act_kernel(%arg0: i32, %arg1: memref<1024x128xbf16, #tpu.memory_space<vmem>>, %arg2: memref<1x1024xbf16, #tpu.memory_space<vmem>>, %arg3: memref<1x1xf32, #tpu.memory_space<vmem>>, %arg4: memref<1x128xf32, #tpu.memory_space<vmem>>) attributes {dimension_semantics = [#tpu.dimension_semantics<parallel>], iteration_bounds = array<i64: 1>, scalar_prefetch = 0 : i64, scratch_operands = 0 : i64, tpu.core_type = #tpu.core_type<tc>, window_params = [{transform_indices = @transform_0, window_bounds = array<i64: 1024, 128>}, {pipeline_mode = #tpu.pipeline_mode<synchronous>, transform_indices = @transform_1, window_bounds = array<i64: 1, 1024>}, {pipeline_mode = #tpu.pipeline_mode<synchronous>, transform_indices = @transform_2, window_bounds = array<i64: 1, 1>}, {transform_indices = @transform_3, window_bounds = array<i64: 1, 128>}]} {
    %c0 = arith.constant 0 : index
    %c0_0 = arith.constant 0 : index
    %0 = vector.load %arg2[%c0, %c0_0] : memref<1x1024xbf16, #tpu.memory_space<vmem>>, vector<1x1024xbf16>
    %c0_1 = arith.constant 0 : index
    %c0_2 = arith.constant 0 : index
    %1 = vector.load %arg1[%c0_1, %c0_2] : memref<1024x128xbf16, #tpu.memory_space<vmem>>, vector<1024x128xbf16>
    %cst = arith.constant dense<0.000000e+00> : vector<1x128xf32>
    %2 = tpu.matmul %0, %1, %cst {dimension_numbers = #tpu.dot_dimension_numbers<[1], [0], [0], [1], [0, 0, 1, 1], [], []>} : vector<1x1024xbf16>, vector<1024x128xbf16>, vector<1x128xf32> -> vector<1x128xf32>
    %c0_3 = arith.constant 0 : index
    %c0_4 = arith.constant 0 : index
    %3 = vector.load %arg3[%c0_3, %c0_4] : memref<1x1xf32, #tpu.memory_space<vmem>>, vector<1x1xf32>
    %4 = vector.broadcast %3 : vector<1x1xf32> to vector<1x128xf32>
    %5 = arith.addf %2, %4 : vector<1x128xf32>
    %c0_5 = arith.constant 0 : index
    %c0_6 = arith.constant 0 : index
    %6 = vector.load %arg4[%c0_5, %c0_6] : memref<1x128xf32, #tpu.memory_space<vmem>>, vector<1x128xf32>
    tpu.vector_store %arg4[%c0_5, %c0_6], %5 {strides = array<i32>} : memref<1x128xf32, #tpu.memory_space<vmem>>, vector<1x128xf32>,
    return
  }
  func.func @transform_0(%arg0: i32) -> (i32, i32) {
    %c0_i32 = arith.constant 0 : i32
    %c0_i32_0 = arith.constant 0 : i32
    return %c0_i32, %arg0 : i32, i32
  }
  func.func @transform_1(%arg0: i32) -> (i32, i32) {
    %c0_i32 = arith.constant 0 : i32
    %c0_i32_0 = arith.constant 0 : i32
    %c0_i32_1 = arith.constant 0 : i32
    return %c0_i32, %c0_i32_0 : i32, i32
  }
  func.func @transform_2(%arg0: i32) -> (i32, i32) {
    %c0_i32 = arith.constant 0 : i32
    %c0_i32_0 = arith.constant 0 : i32
    %c0_i32_1 = arith.constant 0 : i32
    return %c0_i32, %c0_i32_0 : i32, i32
  }
  func.func @transform_3(%arg0: i32) -> (i32, i32) {
    %c0_i32 = arith.constant 0 : i32
    %c0_i32_0 = arith.constant 0 : i32
    return %c0_i32, %arg0 : i32, i32
  }
}

module attributes {stable_mosaic.version = 11 : i64} {
  func.func @_conv_act_kernel(%arg0: i32, %arg1: memref<64x128xbf16, #tpu.memory_space<vmem>>, %arg2: memref<8x64xbf16, #tpu.memory_space<vmem>>, %arg3: memref<8x1xf32, #tpu.memory_space<vmem>>, %arg4: memref<8x128xf32, #tpu.memory_space<vmem>>) attributes {dimension_semantics = [#tpu.dimension_semantics<parallel>], iteration_bounds = array<i64: 1>, scalar_prefetch = 0 : i64, scratch_operands = 0 : i64, tpu.core_type = #tpu.core_type<tc>, window_params = [{transform_indices = @transform_0, window_bounds = array<i64: 64, 128>}, {pipeline_mode = #tpu.pipeline_mode<synchronous>, transform_indices = @transform_1, window_bounds = array<i64: 8, 64>}, {pipeline_mode = #tpu.pipeline_mode<synchronous>, transform_indices = @transform_2, window_bounds = array<i64: 8, 1>}, {transform_indices = @transform_3, window_bounds = array<i64: 8, 128>}]} {
    %c0 = arith.constant 0 : index
    %c0_0 = arith.constant 0 : index
    %0 = vector.load %arg2[%c0, %c0_0] : memref<8x64xbf16, #tpu.memory_space<vmem>>, vector<8x64xbf16>
    %c0_1 = arith.constant 0 : index
    %c0_2 = arith.constant 0 : index
    %1 = vector.load %arg1[%c0_1, %c0_2] : memref<64x128xbf16, #tpu.memory_space<vmem>>, vector<64x128xbf16>
    %cst = arith.constant dense<0.000000e+00> : vector<8x128xf32>
    %2 = tpu.matmul %0, %1, %cst {dimension_numbers = #tpu.dot_dimension_numbers<[1], [0], [0], [1], [0, 0, 1, 1], [], []>} : vector<8x64xbf16>, vector<64x128xbf16>, vector<8x128xf32> -> vector<8x128xf32>
    %c0_3 = arith.constant 0 : index
    %c0_4 = arith.constant 0 : index
    %3 = vector.load %arg3[%c0_3, %c0_4] : memref<8x1xf32, #tpu.memory_space<vmem>>, vector<8x1xf32>
    %4 = vector.broadcast %3 : vector<8x1xf32> to vector<8x128xf32>
    %5 = arith.addf %2, %4 : vector<8x128xf32>
    %cst_5 = arith.constant 0.000000e+00 : f32
    %6 = vector.broadcast %cst_5 : f32 to vector<8x128xf32>
    %7 = arith.cmpf ogt, %5, %6 : vector<8x128xf32>
    %cst_6 = arith.constant 2.000000e-01 : f32
    %8 = vector.broadcast %cst_6 : f32 to vector<8x128xf32>
    %9 = arith.mulf %8, %5 : vector<8x128xf32>
    %10 = arith.select %7, %5, %9 : vector<8x128xi1>, vector<8x128xf32>
    %c0_7 = arith.constant 0 : index
    %c0_8 = arith.constant 0 : index
    %11 = vector.load %arg4[%c0_7, %c0_8] : memref<8x128xf32, #tpu.memory_space<vmem>>, vector<8x128xf32>
    tpu.vector_store %arg4[%c0_7, %c0_8], %10 {strides = array<i32>} : memref<8x128xf32, #tpu.memory_space<vmem>>, vector<8x128xf32>,
    return
  }
  func.func @transform_0(%arg0: i32) -> (i32, i32) {
    %c0_i32 = arith.constant 0 : i32
    %c0_i32_0 = arith.constant 0 : i32
    return %c0_i32, %arg0 : i32, i32
  }
  func.func @transform_1(%arg0: i32) -> (i32, i32) {
    %c0_i32 = arith.constant 0 : i32
    %c0_i32_0 = arith.constant 0 : i32
    %c0_i32_1 = arith.constant 0 : i32
    return %c0_i32, %c0_i32_0 : i32, i32
  }
  func.func @transform_2(%arg0: i32) -> (i32, i32) {
    %c0_i32 = arith.constant 0 : i32
    %c0_i32_0 = arith.constant 0 : i32
    %c0_i32_1 = arith.constant 0 : i32
    return %c0_i32, %c0_i32_0 : i32, i32
  }
  func.func @transform_3(%arg0: i32) -> (i32, i32) {
    %c0_i32 = arith.constant 0 : i32
    %c0_i32_0 = arith.constant 0 : i32
    return %c0_i32, %arg0 : i32, i32
  }
}

</mosaic_0001>

<bundles_post_ra>
// kernel: multiscale_discriminator_forward.24
= control target key start
LH: loop header
LB: loop body
LE: loop exit
PB: predicated region body
PF: predicated region fallthrough
CT: control target
= control target key end

     0   :  { %v156_v3 = vmov 0   ;;  %vm70_vm0 = vcmask 523264   ;;  %s237_s0 = inlined_call_operand.vmem [shape: bf16[64,256], index: 0, kind: input, shape index: {}]   ;;  %s238_s2 = inlined_call_operand.vmem [shape: f32[8,1], index: 2, kind: input, shape index: {}]   ;;  %s239_s1 = inlined_call_operand.vmem [shape: bf16[8,64], index: 1, kind: input, shape index: {}]   ;;  %s240_s3 = inlined_call_operand.vmem [shape: f32[8,256], index: 3, kind: output, shape index: {}]  }
   0x1   :  { %v138_v0 = vld [vmem:[%s237_s0 + $0x30] sm:$0xf]  ;;  %v153_v1 = vld [vmem:[%s237_s0 + $0x34] sm:$0xf0]  ;;  %v152_v2 = vld [vmem:[%s237_s0 + $0x34] sm:$0xf]  ;;  %155 = vset.pattern.permute.xlu0 %v156_v3 }
   0x2   :  { %v139_v4 = vor.u32 %v153_v1, %v138_v0  ;;  %v140_v5 = vld [vmem:[%s237_s0 + $0x38] sm:$0xf0]  ;;  %v130_v6 = vld [vmem:[%s237_s0 + $0x20] sm:$0xf]  ;;  %v151_v7 = vld [vmem:[%s237_s0 + $0x24] sm:$0xf0] }
   0x3   :  { %v143_v8 = vor.u32 %v152_v2, %v140_v5  ;;  %v150_v9 = vld [vmem:[%s237_s0 + $0x24] sm:$0xf]  ;;  %v132_v10 = vld [vmem:[%s237_s0 + $0x28] sm:$0xf0]  ;;  %v131_v11 = vor.u32 %v151_v7, %v130_v6  ;;  %v122_v13 = vld [vmem:[%s237_s0 + $0x10] sm:$0xf] }
   0x4   :  { %78 = vmatpush.bf16.msra.mxu0 %v139_v4  ;;  %v135_v12 = vor.u32 %v150_v9, %v132_v10  ;;  %v149_v14 = vld [vmem:[%s237_s0 + $0x14] sm:$0xf0]  ;;  %v148_v15 = vld [vmem:[%s237_s0 + $0x14] sm:$0xf]  ;;  %v124_v16 = vld [vmem:[%s237_s0 + $0x18] sm:$0xf0] }
   0x5   :  { %91 = vmatpush.bf16.msra.mxu1 %v143_v8  ;;  %v24_v17 = vld [vmem:[%s238_s2] sm:$0xff]  ;;  %v123_v18 = vor.u32 %v149_v14, %v122_v13  ;;  %v127_v19 = vor.u32 %v148_v15, %v124_v16  ;;  %v147_v21 = vld [vmem:[%s237_s0 + $0x4] sm:$0xf0]  ;;  %v116_v23 = vld [vmem:[%s237_s0 + $0x8] sm:$0xf0] }
   0x6   :  { %27 = vperm.xlu0 %155, %v24_v17   ;;  %v114_v20 = vld [vmem:[%s237_s0] sm:$0xf]  ;;  %v146_v22 = vld [vmem:[%s237_s0 + $0x4] sm:$0xf] }
   0x7   :  { %v115_v24 = vor.u32 %v147_v21, %v114_v20  ;;  %v119_v25 = vor.u32 %v146_v22, %v116_v23  ;;  %v15_v26 = vld [vmem:[%s239_s1] sm:$0xf] }
   0x8   :  { %79 = vmatpush.bf16.msra.mxu0 %v131_v11 }
   0x9   :  { %92 = vmatpush.bf16.msra.mxu1 %v135_v12 }
   0xc   :  { %80 = vmatpush.bf16.msra.mxu0 %v123_v18 }
   0xd   :  { %93 = vmatpush.bf16.msra.mxu1 %v127_v19 }
  0x10   :  { %81 = vmatpush.bf16.msra.mxu0 %v115_v24 }
  0x11   :  { %94 = vmatpush.bf16.msra.mxu1 %v119_v25 }
  0x13   :  { %144 = vmatmul.msk.bf16.vlgmr.msra.gmra.mxu0 %vm70_vm0, %v15_v26 }
  0x14   :  { %145 = vmatmul.msk.bf16.vlgmr.msra.gmra.mxu1 %vm70_vm0, %v15_v26 }
  0x78   :  { %v28_v27 = vpop.permute.xlu0 %27 }
  0x90   :  { %v83_v28 = vpop.f32.mrf.mxu0 }
  0x91   :  { %v84_v29 = vadd.f32 %v83_v28, %v28_v27  ;;  %v96_v30 = vpop.f32.mrf.mxu1 }
  0x92   :  { %v97_v31 = vadd.f32 %v96_v30, %v28_v27 }
  0x93   :  { %vm100_vm1 = vcmp.gt.f32.partialorder %v84_v29, 0.0  ;;  %v102_v32 = vmul.f32 0.2, %v84_v29 }
  0x94   :  { %vm101_vm2 = vcmp.gt.f32.partialorder %v97_v31, 0.0  ;;  %v103_v33 = vmul.f32 0.2, %v97_v31 }
  0x95   :  { %v104_v34 = vsel %vm100_vm1, %v84_v29, %v102_v32 }
  0x96   :  { %106 = vst [vmem:[%s240_s3] sm:$0xff] %v104_v34  ;;  %v105_v35 = vsel %vm101_vm2, %v97_v31, %v103_v33 }
  0x97   :  { %107 = vst [vmem:[%s240_s3 + $0x8] sm:$0xff] %v105_v35 }
  0x98   :  { %v85_v36 = vpop.f32.mrf.mxu0 }
  0x99   :  { %v98_v37 = vpop.f32.mrf.mxu1 }

// kernel: multiscale_discriminator_forward.26
= control target key start
LH: loop header
LB: loop body
LE: loop exit
PB: predicated region body
PF: predicated region fallthrough
CT: control target
= control target key end

     0   :  { %v65_v0 = vmov 0   ;;  %s107_s2 = inlined_call_operand.vmem [shape: f32[16,1], index: 2, kind: input, shape index: {}]   ;;  %s108_s1 = inlined_call_operand.vmem [shape: f32[16,1], index: 1, kind: input, shape index: {}]   ;;  %s109_s0 = inlined_call_operand.vmem [shape: bf16[16,128], index: 0, kind: input, shape index: {}]   ;;  %s110_s3 = inlined_call_operand.vmem [shape: f32[16,128], index: 3, kind: output, shape index: {}]  }
   0x1   :  { %64 = vset.pattern.permute.xlu1 %v65_v0  ;;  %63 = vset.pattern.permute.xlu0 %v65_v0  ;;  %v32_v1 = vld [vmem:[%s107_s2] sm:$0xff]  ;;  %v33_v3 = vld [vmem:[%s107_s2 + $0x8] sm:$0xff] }
   0x2   :  { %v18_v2 = vld [vmem:[%s108_s1] sm:$0xff]  ;;  %36 = vperm.xlu1 %64, %v32_v1   ;;  %v19_v4 = vld [vmem:[%s108_s1 + $0x8] sm:$0xff] }
   0x3   :  { %22 = vperm.xlu0 %63, %v18_v2   ;;  %v59_v5 = vld [vmem:[%s109_s0] sm:$0xff]  }
   0x4   :  { %v60_v6 = vunpack.c.l.bf16 %v59_v5  ;;  %v61_v12 = vunpack.c.h.bf16 %v59_v5 }
   0xa   :  { %41 = vperm.xlu1 %64, %v33_v3  }
   0xb   :  { %27 = vperm.xlu0 %63, %v19_v4  }
  0x74   :  { %v37_v7 = vpop.permute.xlu1 %36 }
  0x75   :  { %v23_v8 = vpop.permute.xlu0 %22 }
  0x76   :  { %v30_v9 = vmul.f32 %v60_v6, %v23_v8 }
  0x78   :  { %v44_v10 = vadd.f32 %v37_v7, %v30_v9 }
  0x7a   :  { %vm46_vm0 = vcmp.gt.f32.partialorder %v44_v10, 0.0  ;;  %v48_v11 = vmul.f32 0.2, %v44_v10 }
  0x7c   :  { %v50_v13 = vsel %vm46_vm0, %v44_v10, %v48_v11  ;;  %v42_v16 = vpop.permute.xlu1 %41 }
  0x7d   :  { %52 = vst [vmem:[%s110_s3] sm:$0xff] %v50_v13  ;;  %v28_v14 = vpop.permute.xlu0 %27 }
  0x7e   :  { %v31_v15 = vmul.f32 %v61_v12, %v28_v14 }
  0x80   :  { %v45_v17 = vadd.f32 %v42_v16, %v31_v15 }
  0x82   :  { %vm47_vm1 = vcmp.gt.f32.partialorder %v45_v17, 0.0  ;;  %v49_v18 = vmul.f32 0.2, %v45_v17 }
  0x84   :  { %v51_v19 = vsel %vm47_vm1, %v45_v17, %v49_v18 }
  0x85   :  { %53 = vst [vmem:[%s110_s3 + $0x8] sm:$0xff] %v51_v19 }

// kernel: multiscale_discriminator_forward.25
= control target key start
LH: loop header
LB: loop body
LE: loop exit
PB: predicated region body
PF: predicated region fallthrough
CT: control target
= control target key end

     0   :  { %v194_v2 = vmov 0   ;;  %vm118_vm0 = vcmask 7168   ;;  %vm127_vm1 = vcmask 15368   ;;  %s268_s0 = inlined_call_operand.vmem [shape: bf16[128,128], index: 0, kind: input, shape index: {}]   ;;  %s269_s2 = inlined_call_operand.vmem [shape: f32[16,1], index: 2, kind: input, shape index: {}]   ;;  %s270_s1 = inlined_call_operand.vmem [shape: bf16[16,128], index: 1, kind: input, shape index: {}]   ;;  %s271_s3 = inlined_call_operand.vmem [shape: bf16[16,128], index: 3, kind: output, shape index: {0}]   ;;  %s272_s4 = inlined_call_operand.vmem [shape: f32[1,16,2], index: 4, kind: output, shape index: {1}]  }
   0x1   :  { %v186_v0 = vld [vmem:[%s268_s0 + $0x38] sm:$0xff]  ;;  %v185_v1 = vld [vmem:[%s268_s0 + $0x30] sm:$0xff]  ;;  %193 = vset.pattern.permute.xlu0 %v194_v2  ;;  %v34_v3 = vld [vmem:[%s269_s2] sm:$0xff] }
   0x2   :  { %100 = vmatpush.bf16.msra.mxu0 %v186_v0  ;;  %38 = vperm.xlu0 %193, %v34_v3   ;;  %v184_v4 = vld [vmem:[%s268_s0 + $0x28] sm:$0xff]  ;;  %v183_v6 = vld [vmem:[%s268_s0 + $0x20] sm:$0xff]  ;;  %v182_v7 = vld [vmem:[%s268_s0 + $0x18] sm:$0xff] }
   0x3   :  { %v35_v5 = vld [vmem:[%s269_s2 + $0x8] sm:$0xff]  ;;  %v181_v8 = vld [vmem:[%s268_s0 + $0x10] sm:$0xff]  ;;  %v179_v10 = vld [vmem:[%s268_s0] sm:$0xff] }
   0x4   :  { %v180_v9 = vld [vmem:[%s268_s0 + $0x8] sm:$0xff]  ;;  %v178_v11 = vld [vmem:[%s270_s1] sm:$0xff] }
   0x6   :  { %101 = vmatpush.bf16.msra.mxu0 %v185_v1 }
   0xa   :  { %102 = vmatpush.bf16.msra.mxu0 %v184_v4  ;;  %43 = vperm.xlu0 %193, %v35_v5  }
   0xe   :  { %103 = vmatpush.bf16.msra.mxu0 %v183_v6 }
  0x12   :  { %104 = vmatpush.bf16.msra.mxu0 %v182_v7 }
  0x16   :  { %105 = vmatpush.bf16.msra.mxu0 %v181_v8 }
  0x1a   :  { %106 = vmatpush.bf16.msra.mxu0 %v180_v9 }
  0x1e   :  { %107 = vmatpush.bf16.msra.mxu0 %v179_v10 }
  0x21   :  { %108 = vmatmul.bf16.vlgmr.msra.gmra.mxu0 %v178_v11 }
  0x74   :  { %v39_v12 = vpop.permute.xlu0 %38 }
  0x7c   :  { %v44_v16 = vpop.permute.xlu0 %43 }
  0x9e   :  { %v109_v13 = vpop.f32.mrf.mxu0 }
  0x9f   :  { %v110_v14 = vadd.f32 %v109_v13, %v39_v12 }
  0xa1   :  { %114 = vadd.xlane.f32.xlu1 %v110_v14  ;;  %v121_v15 = vmul.f32 %v110_v14, %v110_v14 }
  0xa3   :  { %123 = vadd.xlane.f32.xlu2 %v121_v15 }
  0xa6   :  { %v111_v17 = vpop.f32.mrf.mxu0 }
  0xa7   :  { %v112_v18 = vadd.f32 %v111_v17, %v44_v16 }
  0xa9   :  { %v190_v19 = vpack.c.bf16 %v112_v18, %v110_v14  ;;  %116 = vadd.xlane.f32.xlu1 %v112_v18  ;;  %v122_v20 = vmul.f32 %v112_v18, %v112_v18 }
  0xab   :  { %191 = vst [vmem:[%s271_s3] sm:$0xff] %v190_v19   ;;  %125 = vadd.xlane.f32.xlu2 %v122_v20 }
 0x114   :  { %v115_v21 = vpop.xlane.xlu1 %114 }
 0x115   :  { %119 = vst.msk [vmem:[%s272_s4] sm:$0xff] %vm118_vm0, %v115_v21 }
 0x116   :  { %v124_v22 = vpop.xlane.xlu2 %123 }
 0x117   :  { %128 = vst.msk [vmem:[%s272_s4] sm:$0xff] %vm127_vm1, %v124_v22 }
 0x11c   :  { %v117_v23 = vpop.xlane.xlu1 %116 }
 0x11d   :  { %120 = vst.msk [vmem:[%s272_s4 + $0x8] sm:$0xff] %vm118_vm0, %v117_v23 }
 0x11e   :  { %v126_v24 = vpop.xlane.xlu2 %125 }
 0x11f   :  { %129 = vst.msk [vmem:[%s272_s4 + $0x8] sm:$0xff] %vm127_vm1, %v126_v24 }

// kernel: multiscale_discriminator_forward.28
= control target key start
LH: loop header
LB: loop body
LE: loop exit
PB: predicated region body
PF: predicated region fallthrough
CT: control target
= control target key end

     0   :  { %v111_v0 = vmov 0   ;;  %s174_s1 = inlined_call_operand.vmem [shape: f32[32,1], index: 1, kind: input, shape index: {}]   ;;  %s175_s2 = inlined_call_operand.vmem [shape: f32[32,1], index: 2, kind: input, shape index: {}]   ;;  %s176_s0 = inlined_call_operand.vmem [shape: bf16[32,128], index: 0, kind: input, shape index: {}]   ;;  %s177_s3 = inlined_call_operand.vmem [shape: f32[32,128], index: 3, kind: output, shape index: {}]  }
   0x1   :  { %109 = vset.pattern.permute.xlu1 %v111_v0  ;;  %108 = vset.pattern.permute.xlu0 %v111_v0  ;;  %v24_v1 = vld [vmem:[%s174_s1 + $0x10] sm:$0xff]  ;;  %v22_v2 = vld [vmem:[%s174_s1] sm:$0xff]  ;;  %v25_v4 = vld [vmem:[%s174_s1 + $0x18] sm:$0xff] }
   0x2   :  { %38 = vperm.xlu1 %109, %v24_v1   ;;  %28 = vperm.xlu0 %108, %v22_v2   ;;  %v50_v3 = vld [vmem:[%s175_s2] sm:$0xff]  ;;  %v23_v5 = vld [vmem:[%s174_s1 + $0x8] sm:$0xff]  ;;  %v53_v7 = vld [vmem:[%s175_s2 + $0x18] sm:$0xff] }
   0x3   :  { %110 = vset.pattern.permute.xlu2 %v111_v0  ;;  %v51_v6 = vld [vmem:[%s175_s2 + $0x8] sm:$0xff]  ;;  %v52_v8 = vld [vmem:[%s175_s2 + $0x10] sm:$0xff]  ;;  %v99_v9 = vld [vmem:[%s176_s0] sm:$0xff]  }
   0x4   :  { %56 = vperm.xlu2 %110, %v50_v3   ;;  %v100_v10 = vunpack.c.l.bf16 %v99_v9  ;;  %v101_v17 = vunpack.c.h.bf16 %v99_v9  ;;  %v106_v19 = vld [vmem:[%s176_s0 + $0x8] sm:$0xff]  }
   0x5   :  { %v104_v24 = vunpack.c.l.bf16 %v106_v19  ;;  %v105_v25 = vunpack.c.h.bf16 %v106_v19 }
   0xa   :  { %43 = vperm.xlu1 %109, %v25_v4   ;;  %33 = vperm.xlu0 %108, %v23_v5  }
   0xc   :  { %61 = vperm.xlu2 %110, %v51_v6  }
  0x12   :  { %71 = vperm.xlu1 %109, %v53_v7   ;;  %66 = vperm.xlu0 %108, %v52_v8  }
  0x5e   :  { %v57_v11 = vpop.permute.xlu2 %56 }
  0x66   :  { %v62_v23 = vpop.permute.xlu2 %61 }
  0x74   :  { %v39_v12 = vpop.permute.xlu1 %38  ;;  %v29_v13 = vpop.permute.xlu0 %28 }
  0x75   :  { %v46_v14 = vmul.f32 %v100_v10, %v29_v13  ;;  %v48_v28 = vmul.f32 %v104_v24, %v39_v12 }
  0x77   :  { %v74_v15 = vadd.f32 %v57_v11, %v46_v14 }
  0x79   :  { %vm78_vm0 = vcmp.gt.f32.partialorder %v74_v15, 0.0  ;;  %v82_v16 = vmul.f32 0.2, %v74_v15 }
  0x7b   :  { %v86_v18 = vsel %vm78_vm0, %v74_v15, %v82_v16 }
  0x7c   :  { %90 = vst [vmem:[%s177_s3] sm:$0xff] %v86_v18  ;;  %v44_v20 = vpop.permute.xlu1 %43  ;;  %v34_v21 = vpop.permute.xlu0 %33 }
  0x7d   :  { %v47_v22 = vmul.f32 %v101_v17, %v34_v21  ;;  %v49_v29 = vmul.f32 %v105_v25, %v44_v20 }
  0x7f   :  { %v75_v26 = vadd.f32 %v62_v23, %v47_v22 }
  0x81   :  { %vm79_vm1 = vcmp.gt.f32.partialorder %v75_v26, 0.0  ;;  %v83_v27 = vmul.f32 0.2, %v75_v26 }
  0x83   :  { %v87_v30 = vsel %vm79_vm1, %v75_v26, %v83_v27 }
  0x84   :  { %91 = vst [vmem:[%s177_s3 + $0x8] sm:$0xff] %v87_v30  ;;  %v72_v31 = vpop.permute.xlu1 %71  ;;  %v67_v32 = vpop.permute.xlu0 %66 }
  0x85   :  { %v77_v33 = vadd.f32 %v72_v31, %v49_v29  ;;  %v76_v34 = vadd.f32 %v67_v32, %v48_v28 }
  0x87   :  { %vm81_vm2 = vcmp.gt.f32.partialorder %v77_v33, 0.0  ;;  %v85_v35 = vmul.f32 0.2, %v77_v33  ;;  %vm80_vm3 = vcmp.gt.f32.partialorder %v76_v34, 0.0  ;;  %v84_v36 = vmul.f32 0.2, %v76_v34 }
  0x89   :  { %v89_v37 = vsel %vm81_vm2, %v77_v33, %v85_v35  ;;  %v88_v38 = vsel %vm80_vm3, %v76_v34, %v84_v36 }
  0x8a   :  { %93 = vst [vmem:[%s177_s3 + $0x18] sm:$0xff] %v89_v37 }
  0x8b   :  { %92 = vst [vmem:[%s177_s3 + $0x10] sm:$0xff] %v88_v38 }

// kernel: multiscale_discriminator_forward.27
= control target key start
LH: loop header
LB: loop body
LE: loop exit
PB: predicated region body
PF: predicated region fallthrough
CT: control target
= control target key end

     0   :  { %v406_v4 = vmov 0   ;;  %vm238_vm0 = vcmask 7168   ;;  %vm255_vm1 = vcmask 15368   ;;  %s546_s0 = inlined_call_operand.vmem [shape: bf16[256,128], index: 0, kind: input, shape index: {}]   ;;  %s547_s2 = inlined_call_operand.vmem [shape: f32[32,1], index: 2, kind: input, shape index: {}]   ;;  %s548_s1 = inlined_call_operand.vmem [shape: bf16[32,256], index: 1, kind: input, shape index: {}]   ;;  %s549_s3 = inlined_call_operand.vmem [shape: bf16[32,128], index: 3, kind: output, shape index: {0}]   ;;  %s550_s4 = inlined_call_operand.vmem [shape: f32[1,32,2], index: 4, kind: output, shape index: {1}]  }
   0x1   :  { %v367_v0 = vld [vmem:[%s546_s0 + $0x38] sm:$0xff]  ;;  %v366_v2 = vld [vmem:[%s546_s0 + $0x30] sm:$0xff]  ;;  %404 = vset.pattern.permute.xlu0 %v406_v4  ;;  %405 = vset.pattern.permute.xlu1 %v406_v4  ;;  %v365_v5 = vld [vmem:[%s546_s0 + $0x28] sm:$0xff] }
   0x2   :  { %v375_v1 = vld [vmem:[%s546_s0 + $0x78] sm:$0xff]  ;;  %192 = vmatpush.bf16.msra.mxu0 %v367_v0  ;;  %v374_v3 = vld [vmem:[%s546_s0 + $0x70] sm:$0xff]  ;;  %387 = vmatpush.bf16.msra.mxu2 %v367_v0  ;;  %v373_v6 = vld [vmem:[%s546_s0 + $0x68] sm:$0xff] }
   0x3   :  { %211 = vmatpush.bf16.msra.mxu1 %v375_v1  ;;  %395 = vmatpush.bf16.msra.mxu3 %v375_v1  ;;  %v52_v7 = vld [vmem:[%s547_s2] sm:$0xff]  ;;  %v54_v8 = vld [vmem:[%s547_s2 + $0x10] sm:$0xff]  ;;  %v53_v11 = vld [vmem:[%s547_s2 + $0x8] sm:$0xff] }
   0x4   :  { %58 = vperm.xlu0 %404, %v52_v7   ;;  %68 = vperm.xlu1 %405, %v54_v8   ;;  %v364_v9 = vld [vmem:[%s546_s0 + $0x20] sm:$0xff]  ;;  %v363_v12 = vld [vmem:[%s546_s0 + $0x18] sm:$0xff]  ;;  %v362_v15 = vld [vmem:[%s546_s0 + $0x10] sm:$0xff] }
   0x5   :  { %v372_v10 = vld [vmem:[%s546_s0 + $0x60] sm:$0xff]  ;;  %v371_v13 = vld [vmem:[%s546_s0 + $0x58] sm:$0xff]  ;;  %v370_v16 = vld [vmem:[%s546_s0 + $0x50] sm:$0xff] }
   0x6   :  { %193 = vmatpush.bf16.msra.mxu0 %v366_v2  ;;  %388 = vmatpush.bf16.msra.mxu2 %v366_v2  ;;  %v55_v14 = vld [vmem:[%s547_s2 + $0x18] sm:$0xff]  ;;  %v361_v17 = vld [vmem:[%s546_s0 + $0x8] sm:$0xff]  ;;  %v360_v19 = vld [vmem:[%s546_s0] sm:$0xff] }
   0x7   :  { %212 = vmatpush.bf16.msra.mxu1 %v374_v3  ;;  %396 = vmatpush.bf16.msra.mxu3 %v374_v3  ;;  %v369_v18 = vld [vmem:[%s546_s0 + $0x48] sm:$0xff]  ;;  %v368_v20 = vld [vmem:[%s546_s0 + $0x40] sm:$0xff]  ;;  %v286_v25 = vld [vmem:[%s548_s1 + $0x10] sm:$0xf] }
   0x8   :  { %v278_v21 = vld [vmem:[%s548_s1] sm:$0xf]  ;;  %v357_v22 = vld [vmem:[%s548_s1 + $0x4] sm:$0xf0]  ;;  %v356_v23 = vld [vmem:[%s548_s1 + $0x4] sm:$0xf] }
   0x9   :  { %v280_v24 = vld [vmem:[%s548_s1 + $0x8] sm:$0xf0]  ;;  %v359_v26 = vld [vmem:[%s548_s1 + $0x14] sm:$0xf0]  ;;  %v358_v27 = vld [vmem:[%s548_s1 + $0x14] sm:$0xf]  ;;  %v279_v29 = vor.u32 %v357_v22, %v278_v21 }
   0xa   :  { %194 = vmatpush.bf16.msra.mxu0 %v365_v5  ;;  %389 = vmatpush.bf16.msra.mxu2 %v365_v5  ;;  %v288_v28 = vld [vmem:[%s548_s1 + $0x18] sm:$0xf0]  ;;  %v283_v30 = vor.u32 %v356_v23, %v280_v24  ;;  %v287_v31 = vor.u32 %v359_v26, %v286_v25 }
   0xb   :  { %213 = vmatpush.bf16.msra.mxu1 %v373_v6  ;;  %397 = vmatpush.bf16.msra.mxu3 %v373_v6  ;;  %v291_v32 = vor.u32 %v358_v27, %v288_v28 }
   0xc   :  { %63 = vperm.xlu0 %404, %v53_v11   ;;  %73 = vperm.xlu1 %405, %v55_v14  }
   0xe   :  { %195 = vmatpush.bf16.msra.mxu0 %v364_v9  ;;  %390 = vmatpush.bf16.msra.mxu2 %v364_v9 }
   0xf   :  { %214 = vmatpush.bf16.msra.mxu1 %v372_v10  ;;  %398 = vmatpush.bf16.msra.mxu3 %v372_v10 }
  0x12   :  { %196 = vmatpush.bf16.msra.mxu0 %v363_v12  ;;  %391 = vmatpush.bf16.msra.mxu2 %v363_v12 }
  0x13   :  { %215 = vmatpush.bf16.msra.mxu1 %v371_v13  ;;  %399 = vmatpush.bf16.msra.mxu3 %v371_v13 }
  0x16   :  { %197 = vmatpush.bf16.msra.mxu0 %v362_v15  ;;  %392 = vmatpush.bf16.msra.mxu2 %v362_v15 }
  0x17   :  { %216 = vmatpush.bf16.msra.mxu1 %v370_v16  ;;  %400 = vmatpush.bf16.msra.mxu3 %v370_v16 }
  0x1a   :  { %198 = vmatpush.bf16.msra.mxu0 %v361_v17  ;;  %393 = vmatpush.bf16.msra.mxu2 %v361_v17 }
  0x1b   :  { %217 = vmatpush.bf16.msra.mxu1 %v369_v18  ;;  %401 = vmatpush.bf16.msra.mxu3 %v369_v18 }
  0x1e   :  { %199 = vmatpush.bf16.msra.mxu0 %v360_v19  ;;  %394 = vmatpush.bf16.msra.mxu2 %v360_v19 }
  0x1f   :  { %218 = vmatpush.bf16.msra.mxu1 %v368_v20  ;;  %402 = vmatpush.bf16.msra.mxu3 %v368_v20 }
  0x21   :  { %200 = vmatmul.bf16.vlgmr.msra.gmra.mxu0 %v279_v29  ;;  %205 = vmatmul.bf16.vlgmr.msra.gmra.mxu2 %v287_v31 }
  0x22   :  { %219 = vmatmul.bf16.vlgmr.msra.gmra.mxu1 %v283_v30  ;;  %224 = vmatmul.bf16.vlgmr.msra.gmra.mxu3 %v291_v32 }
  0x76   :  { %v59_v33 = vpop.permute.xlu0 %58  ;;  %v69_v38 = vpop.permute.xlu1 %68 }
  0x7e   :  { %v64_v41 = vpop.permute.xlu0 %63  ;;  %v74_v49 = vpop.permute.xlu1 %73 }
  0x9e   :  { %v201_v34 = vpop.f32.mrf.mxu0 }
  0x9f   :  { %v220_v35 = vpop.f32.mrf.mxu1  ;;  %v202_v36 = vadd.f32 %v201_v34, %v59_v33 }
  0xa1   :  { %v221_v37 = vadd.f32 %v220_v35, %v202_v36 }
  0xa3   :  { %230 = vadd.xlane.f32.xlu2 %v221_v37  ;;  %v243_v54 = vmul.f32 %v221_v37, %v221_v37 }
  0xa4   :  { %v206_v39 = vpop.f32.mrf.mxu2 }
  0xa5   :  { %v225_v40 = vpop.f32.mrf.mxu3  ;;  %v207_v43 = vadd.f32 %v206_v39, %v69_v38 }
  0xa6   :  { %v203_v42 = vpop.f32.mrf.mxu0 }
  0xa7   :  { %v204_v44 = vadd.f32 %v203_v42, %v64_v41  ;;  %v222_v45 = vpop.f32.mrf.mxu1  ;;  %v226_v46 = vadd.f32 %v225_v40, %v207_v43 }
  0xa9   :  { %v223_v47 = vadd.f32 %v222_v45, %v204_v44  ;;  %234 = vadd.xlane.f32.xlu0 %v226_v46  ;;  %v245_v57 = vmul.f32 %v226_v46, %v226_v46 }
  0xab   :  { %v379_v48 = vpack.c.bf16 %v223_v47, %v221_v37  ;;  %232 = vadd.xlane.f32.xlu2 %v223_v47  ;;  %v244_v56 = vmul.f32 %v223_v47, %v223_v47 }
  0xac   :  { %v208_v50 = vpop.f32.mrf.mxu2 }
  0xad   :  { %380 = vst [vmem:[%s549_s3] sm:$0xff] %v379_v48   ;;  %v227_v51 = vpop.f32.mrf.mxu3  ;;  %v209_v52 = vadd.f32 %v208_v50, %v74_v49 }
  0xaf   :  { %v228_v53 = vadd.f32 %v227_v51, %v209_v52 }
  0xb1   :  { %v384_v55 = vpack.c.bf16 %v228_v53, %v226_v46  ;;  %236 = vadd.xlane.f32.xlu1 %v228_v53  ;;  %v246_v58 = vmul.f32 %v228_v53, %v228_v53 }
  0xb3   :  { %247 = vadd.xlane.f32.xlu2 %v243_v54  ;;  %386 = vst [vmem:[%s549_s3 + $0x8] sm:$0xff] %v384_v55  }
  0xbb   :  { %249 = vadd.xlane.f32.xlu2 %v244_v56 }
  0xc3   :  { %251 = vadd.xlane.f32.xlu2 %v245_v57 }
  0xcb   :  { %253 = vadd.xlane.f32.xlu2 %v246_v58 }
 0x116   :  { %v231_v59 = vpop.xlane.xlu2 %230 }
 0x117   :  { %239 = vst.msk [vmem:[%s550_s4] sm:$0xff] %vm238_vm0, %v231_v59 }
 0x11c   :  { %v235_v60 = vpop.xlane.xlu0 %234 }
 0x11d   :  { %241 = vst.msk [vmem:[%s550_s4 + $0x10] sm:$0xff] %vm238_vm0, %v235_v60 }
 0x11e   :  { %v233_v61 = vpop.xlane.xlu2 %232 }
 0x11f   :  { %240 = vst.msk [vmem:[%s550_s4 + $0x8] sm:$0xff] %vm238_vm0, %v233_v61 }
 0x124   :  { %v237_v62 = vpop.xlane.xlu1 %236 }
 0x125   :  { %242 = vst.msk [vmem:[%s550_s4 + $0x18] sm:$0xff] %vm238_vm0, %v237_v62 }
 0x126   :  { %v248_v63 = vpop.xlane.xlu2 %247 }
 0x127   :  { %256 = vst.msk [vmem:[%s550_s4] sm:$0xff] %vm255_vm1, %v248_v63 }
 0x12e   :  { %v250_v0 = vpop.xlane.xlu2 %249 }
 0x12f   :  { %257 = vst.msk [vmem:[%s550_s4 + $0x8] sm:$0xff] %vm255_vm1, %v250_v0 }
 0x136   :  { %v252_v1 = vpop.xlane.xlu2 %251 }
 0x137   :  { %258 = vst.msk [vmem:[%s550_s4 + $0x10] sm:$0xff] %vm255_vm1, %v252_v1 }
 0x13e   :  { %v254_v2 = vpop.xlane.xlu2 %253 }
 0x13f   :  { %259 = vst.msk [vmem:[%s550_s4 + $0x18] sm:$0xff] %vm255_vm1, %v254_v2 }

// kernel: multiscale_discriminator_forward.30
= control target key start
LH: loop header
LB: loop body
LE: loop exit
PB: predicated region body
PF: predicated region fallthrough
CT: control target
= control target key end

     0   :  { %v201_v0 = vmov 0   ;;  %s306_s1 = inlined_call_operand.vmem [shape: f32[64,1], index: 1, kind: input, shape index: {}]   ;;  %s307_s2 = inlined_call_operand.vmem [shape: f32[64,1], index: 2, kind: input, shape index: {}]   ;;  %s308_s0 = inlined_call_operand.vmem [shape: bf16[64,128], index: 0, kind: input, shape index: {}]   ;;  %s309_s3 = inlined_call_operand.vmem [shape: f32[64,128], index: 3, kind: output, shape index: {}]  }
   0x1   :  { %200 = vset.pattern.permute.xlu2 %v201_v0  ;;  %199 = vset.pattern.permute.xlu1 %v201_v0  ;;  %v34_v1 = vld [vmem:[%s306_s1 + $0x20] sm:$0xff]  ;;  %v32_v2 = vld [vmem:[%s306_s1 + $0x10] sm:$0xff]  ;;  %v35_v4 = vld [vmem:[%s306_s1 + $0x28] sm:$0xff] }
   0x2   :  { %v30_v3 = vld [vmem:[%s306_s1] sm:$0xff]  ;;  %198 = vset.pattern.permute.xlu0 %v201_v0  ;;  %60 = vperm.xlu2 %200, %v34_v1   ;;  %v33_v5 = vld [vmem:[%s306_s1 + $0x18] sm:$0xff]  ;;  %v31_v6 = vld [vmem:[%s306_s1 + $0x8] sm:$0xff] }
   0x3   :  { %50 = vperm.xlu1 %199, %v32_v2   ;;  %40 = vperm.xlu0 %198, %v30_v3   ;;  %v86_v7 = vld [vmem:[%s307_s2] sm:$0xff]  ;;  %v37_v8 = vld [vmem:[%s306_s1 + $0x38] sm:$0xff]  ;;  %v36_v9 = vld [vmem:[%s306_s1 + $0x30] sm:$0xff] }
   0x4   :  { %v89_v10 = vld [vmem:[%s307_s2 + $0x18] sm:$0xff]  ;;  %v88_v11 = vld [vmem:[%s307_s2 + $0x10] sm:$0xff]  ;;  %v87_v12 = vld [vmem:[%s307_s2 + $0x8] sm:$0xff] }
   0x5   :  { %v92_v13 = vld [vmem:[%s307_s2 + $0x30] sm:$0xff]  ;;  %v91_v14 = vld [vmem:[%s307_s2 + $0x28] sm:$0xff]  ;;  %v90_v15 = vld [vmem:[%s307_s2 + $0x20] sm:$0xff] }
   0x6   :  { %v93_v16 = vld [vmem:[%s307_s2 + $0x38] sm:$0xff]  ;;  %v179_v19 = vld [vmem:[%s308_s0] sm:$0xff]   ;;  %v194_v25 = vld [vmem:[%s308_s0 + $0x8] sm:$0xff]  }
   0x7   :  { %v180_v21 = vunpack.c.l.bf16 %v179_v19  ;;  %v185_v28 = vunpack.c.h.bf16 %v194_v25  ;;  %v196_v34 = vld [vmem:[%s308_s0 + $0x18] sm:$0xff]   ;;  %v184_v43 = vunpack.c.l.bf16 %v194_v25  ;;  %v181_v44 = vunpack.c.h.bf16 %v179_v19  ;;  %v195_v47 = vld [vmem:[%s308_s0 + $0x10] sm:$0xff]  }
   0x8   :  { %v192_v37 = vunpack.c.l.bf16 %v196_v34  ;;  %v188_v55 = vunpack.c.l.bf16 %v195_v47  ;;  %v189_v56 = vunpack.c.h.bf16 %v195_v47  ;;  %v193_v3 = vunpack.c.h.bf16 %v196_v34 }
   0xa   :  { %65 = vperm.xlu2 %200, %v35_v4  }
   0xb   :  { %55 = vperm.xlu1 %199, %v33_v5   ;;  %45 = vperm.xlu0 %198, %v31_v6  }
  0x12   :  { %96 = vperm.xlu2 %200, %v86_v7  }
  0x13   :  { %75 = vperm.xlu1 %199, %v37_v8   ;;  %70 = vperm.xlu0 %198, %v36_v9  }
  0x1a   :  { %111 = vperm.xlu2 %200, %v89_v10  }
  0x1b   :  { %106 = vperm.xlu1 %199, %v88_v11   ;;  %101 = vperm.xlu0 %198, %v87_v12  }
  0x22   :  { %126 = vperm.xlu2 %200, %v92_v13  }
  0x23   :  { %121 = vperm.xlu1 %199, %v91_v14   ;;  %116 = vperm.xlu0 %198, %v90_v15  }
  0x2b   :  { %131 = vperm.xlu0 %198, %v93_v16  }
  0x5c   :  { %v61_v17 = vpop.permute.xlu2 %60 }
  0x5d   :  { %v82_v61 = vmul.f32 %v188_v55, %v61_v17 }
  0x64   :  { %v66_v18 = vpop.permute.xlu2 %65 }
  0x65   :  { %v83_v62 = vmul.f32 %v189_v56, %v66_v18 }
  0x6c   :  { %v97_v20 = vpop.permute.xlu2 %96 }
  0x74   :  { %v112_v29 = vpop.permute.xlu2 %111 }
  0x75   :  { %v51_v22 = vpop.permute.xlu1 %50  ;;  %v41_v23 = vpop.permute.xlu0 %40 }
  0x76   :  { %v78_v24 = vmul.f32 %v180_v21, %v41_v23  ;;  %v80_v48 = vmul.f32 %v184_v43, %v51_v22 }
  0x78   :  { %v134_v26 = vadd.f32 %v97_v20, %v78_v24 }
  0x7a   :  { %vm142_vm0 = vcmp.gt.f32.partialorder %v134_v26, 0.0  ;;  %v150_v27 = vmul.f32 0.2, %v134_v26 }
  0x7c   :  { %v158_v30 = vsel %vm142_vm0, %v134_v26, %v150_v27  ;;  %v127_v42 = vpop.permute.xlu2 %126 }
  0x7d   :  { %166 = vst [vmem:[%s309_s3] sm:$0xff] %v158_v30  ;;  %v56_v31 = vpop.permute.xlu1 %55  ;;  %v46_v32 = vpop.permute.xlu0 %45 }
  0x7e   :  { %v81_v33 = vmul.f32 %v185_v28, %v56_v31  ;;  %v79_v49 = vmul.f32 %v181_v44, %v46_v32 }
  0x80   :  { %v137_v35 = vadd.f32 %v112_v29, %v81_v33 }
  0x82   :  { %vm145_vm1 = vcmp.gt.f32.partialorder %v137_v35, 0.0  ;;  %v153_v36 = vmul.f32 0.2, %v137_v35 }
  0x84   :  { %v161_v38 = vsel %vm145_vm1, %v137_v35, %v153_v36 }
  0x85   :  { %169 = vst [vmem:[%s309_s3 + $0x18] sm:$0xff] %v161_v38  ;;  %v76_v39 = vpop.permute.xlu1 %75  ;;  %v71_v40 = vpop.permute.xlu0 %70 }
  0x86   :  { %v84_v41 = vmul.f32 %v192_v37, %v71_v40  ;;  %v85_v8 = vmul.f32 %v193_v3, %v76_v39 }
  0x88   :  { %v140_v45 = vadd.f32 %v127_v42, %v84_v41 }
  0x8a   :  { %vm148_vm2 = vcmp.gt.f32.partialorder %v140_v45, 0.0  ;;  %v156_v46 = vmul.f32 0.2, %v140_v45 }
  0x8c   :  { %v164_v50 = vsel %vm148_vm2, %v140_v45, %v156_v46 }
  0x8d   :  { %172 = vst [vmem:[%s309_s3 + $0x30] sm:$0xff] %v164_v50  ;;  %v107_v51 = vpop.permute.xlu1 %106  ;;  %v102_v52 = vpop.permute.xlu0 %101 }
  0x8e   :  { %v136_v53 = vadd.f32 %v107_v51, %v80_v48  ;;  %v135_v54 = vadd.f32 %v102_v52, %v79_v49 }
  0x90   :  { %vm144_vm3 = vcmp.gt.f32.partialorder %v136_v53, 0.0  ;;  %v152_v57 = vmul.f32 0.2, %v136_v53  ;;  %vm143_vm4 = vcmp.gt.f32.partialorder %v135_v54, 0.0  ;;  %v151_v58 = vmul.f32 0.2, %v135_v54 }
  0x92   :  { %v160_v59 = vsel %vm144_vm3, %v136_v53, %v152_v57  ;;  %v159_v60 = vsel %vm143_vm4, %v135_v54, %v151_v58 }
  0x93   :  { %168 = vst [vmem:[%s309_s3 + $0x10] sm:$0xff] %v160_v59 }
  0x94   :  { %167 = vst [vmem:[%s309_s3 + $0x8] sm:$0xff] %v159_v60 }
  0x95   :  { %v122_v63 = vpop.permute.xlu1 %121  ;;  %v117_v0 = vpop.permute.xlu0 %116 }
  0x96   :  { %v139_v1 = vadd.f32 %v122_v63, %v83_v62  ;;  %v138_v2 = vadd.f32 %v117_v0, %v82_v61 }
  0x98   :  { %vm147_vm5 = vcmp.gt.f32.partialorder %v139_v1, 0.0  ;;  %v155_v4 = vmul.f32 0.2, %v139_v1  ;;  %vm146_vm6 = vcmp.gt.f32.partialorder %v138_v2, 0.0  ;;  %v154_v5 = vmul.f32 0.2, %v138_v2 }
  0x9a   :  { %v163_v6 = vsel %vm147_vm5, %v139_v1, %v155_v4  ;;  %v162_v7 = vsel %vm146_vm6, %v138_v2, %v154_v5 }
  0x9b   :  { %171 = vst [vmem:[%s309_s3 + $0x28] sm:$0xff] %v163_v6 }
  0x9c   :  { %170 = vst [vmem:[%s309_s3 + $0x20] sm:$0xff] %v162_v7 }
  0x9d   :  { %v132_v9 = vpop.permute.xlu0 %131 }
  0x9e   :  { %v141_v10 = vadd.f32 %v132_v9, %v85_v8 }
  0xa0   :  { %vm149_vm7 = vcmp.gt.f32.partialorder %v141_v10, 0.0  ;;  %v157_v11 = vmul.f32 0.2, %v141_v10 }
  0xa2   :  { %v165_v12 = vsel %vm149_vm7, %v141_v10, %v157_v11 }
  0xa3   :  { %173 = vst [vmem:[%s309_s3 + $0x38] sm:$0xff] %v165_v12 }

// kernel: multiscale_discriminator_forward.29
= control target key start
LH: loop header
LB: loop body
LE: loop exit
PB: predicated region body
PF: predicated region fallthrough
CT: control target
= control target key end

     0   :  { %v881_v8 = vmov 0   ;;  %vm548_vm0 = vcmask 7168   ;;  %vm581_vm1 = vcmask 15368   ;;  %s1199_s0 = inlined_call_operand.vmem [shape: bf16[512,128], index: 0, kind: input, shape index: {}]   ;;  %s1200_s2 = inlined_call_operand.vmem [shape: f32[64,1], index: 2, kind: input, shape index: {}]   ;;  %s1201_s1 = inlined_call_operand.vmem [shape: bf16[64,512], index: 1, kind: input, shape index: {}]   ;;  %s1202_s3 = inlined_call_operand.vmem [shape: bf16[64,128], index: 3, kind: output, shape index: {0}]   ;;  %s1203_s4 = inlined_call_operand.vmem [shape: f32[1,64,2], index: 4, kind: output, shape index: {1}]  }
   0x1   :  { %v829_v0 = vld [vmem:[%s1199_s0 + $0x38] sm:$0xff]  ;;  %v828_v4 = vld [vmem:[%s1199_s0 + $0x30] sm:$0xff]  ;;  %878 = vset.pattern.permute.xlu0 %v881_v8  ;;  %879 = vset.pattern.permute.xlu1 %v881_v8  ;;  %v827_v9 = vld [vmem:[%s1199_s0 + $0x28] sm:$0xff] }
   0x2   :  { %v837_v1 = vld [vmem:[%s1199_s0 + $0x78] sm:$0xff]  ;;  %416 = vmatpush.bf16.msra.mxu0 %v829_v0  ;;  %v836_v5 = vld [vmem:[%s1199_s0 + $0x70] sm:$0xff]  ;;  %880 = vset.pattern.permute.xlu2 %v881_v8  ;;  %v835_v10 = vld [vmem:[%s1199_s0 + $0x68] sm:$0xff] }
   0x3   :  { %v845_v2 = vld [vmem:[%s1199_s0 + $0xb8] sm:$0xff]  ;;  %445 = vmatpush.bf16.msra.mxu1 %v837_v1  ;;  %v844_v6 = vld [vmem:[%s1199_s0 + $0xb0] sm:$0xff]  ;;  %v843_v11 = vld [vmem:[%s1199_s0 + $0xa8] sm:$0xff] }
   0x4   :  { %v853_v3 = vld [vmem:[%s1199_s0 + $0xf8] sm:$0xff]  ;;  %474 = vmatpush.bf16.msra.mxu2 %v845_v2  ;;  %v852_v7 = vld [vmem:[%s1199_s0 + $0xf0] sm:$0xff]  ;;  %v851_v12 = vld [vmem:[%s1199_s0 + $0xe8] sm:$0xff] }
   0x5   :  { %503 = vmatpush.bf16.msra.mxu3 %v853_v3  ;;  %v826_v13 = vld [vmem:[%s1199_s0 + $0x20] sm:$0xff]  ;;  %v825_v18 = vld [vmem:[%s1199_s0 + $0x18] sm:$0xff]  ;;  %v824_v22 = vld [vmem:[%s1199_s0 + $0x10] sm:$0xff] }
   0x6   :  { %417 = vmatpush.bf16.msra.mxu0 %v828_v4  ;;  %v834_v14 = vld [vmem:[%s1199_s0 + $0x60] sm:$0xff]  ;;  %v833_v19 = vld [vmem:[%s1199_s0 + $0x58] sm:$0xff]  ;;  %v832_v23 = vld [vmem:[%s1199_s0 + $0x50] sm:$0xff] }
   0x7   :  { %446 = vmatpush.bf16.msra.mxu1 %v836_v5  ;;  %v842_v15 = vld [vmem:[%s1199_s0 + $0xa0] sm:$0xff]  ;;  %v841_v20 = vld [vmem:[%s1199_s0 + $0x98] sm:$0xff]  ;;  %v98_v24 = vld [vmem:[%s1200_s2 + $0x10] sm:$0xff] }
   0x8   :  { %475 = vmatpush.bf16.msra.mxu2 %v844_v6  ;;  %v850_v16 = vld [vmem:[%s1199_s0 + $0xe0] sm:$0xff]  ;;  %v849_v21 = vld [vmem:[%s1199_s0 + $0xd8] sm:$0xff]  ;;  %v840_v25 = vld [vmem:[%s1199_s0 + $0x90] sm:$0xff]  ;;  %116 = vperm.xlu1 %879, %v98_v24  }
   0x9   :  { %504 = vmatpush.bf16.msra.mxu3 %v852_v7  ;;  %v96_v17 = vld [vmem:[%s1200_s2] sm:$0xff]  ;;  %v848_v26 = vld [vmem:[%s1199_s0 + $0xd0] sm:$0xff]  ;;  %v97_v27 = vld [vmem:[%s1200_s2 + $0x8] sm:$0xff] }
   0xa   :  { %418 = vmatpush.bf16.msra.mxu0 %v827_v9  ;;  %106 = vperm.xlu0 %878, %v96_v17   ;;  %v823_v28 = vld [vmem:[%s1199_s0 + $0x8] sm:$0xff]  ;;  %v822_v32 = vld [vmem:[%s1199_s0] sm:$0xff]  ;;  %v808_v37 = vld [vmem:[%s1201_s1 + $0xc] sm:$0xf0] }
   0xb   :  { %447 = vmatpush.bf16.msra.mxu1 %v835_v10  ;;  %v831_v29 = vld [vmem:[%s1199_s0 + $0x48] sm:$0xff]  ;;  %v830_v33 = vld [vmem:[%s1199_s0 + $0x40] sm:$0xff]  ;;  %v618_v39 = vld [vmem:[%s1201_s1 + $0x10] sm:$0xf0] }
   0xc   :  { %476 = vmatpush.bf16.msra.mxu2 %v843_v11  ;;  %v839_v30 = vld [vmem:[%s1199_s0 + $0x88] sm:$0xff]  ;;  %v838_v34 = vld [vmem:[%s1199_s0 + $0x80] sm:$0xff]  ;;  %v809_v41 = vld [vmem:[%s1201_s1 + $0x14] sm:$0xf0] }
   0xd   :  { %505 = vmatpush.bf16.msra.mxu3 %v851_v12  ;;  %v847_v31 = vld [vmem:[%s1199_s0 + $0xc8] sm:$0xff]  ;;  %v846_v35 = vld [vmem:[%s1199_s0 + $0xc0] sm:$0xff]  ;;  %v626_v43 = vld [vmem:[%s1201_s1 + $0x18] sm:$0xf0] }
   0xe   :  { %419 = vmatpush.bf16.msra.mxu0 %v826_v13  ;;  %v616_v36 = vld [vmem:[%s1201_s1] sm:$0xf]  ;;  %v806_v38 = vld [vmem:[%s1201_s1 + $0x4] sm:$0xf]  ;;  %v624_v40 = vld [vmem:[%s1201_s1 + $0x8] sm:$0xf] }
   0xf   :  { %448 = vmatpush.bf16.msra.mxu1 %v834_v14  ;;  %v807_v42 = vld [vmem:[%s1201_s1 + $0xc] sm:$0xf]  ;;  %v617_v44 = vor.u32 %v808_v37, %v616_v36  ;;  %v621_v45 = vor.u32 %v806_v38, %v618_v39  ;;  %v625_v46 = vor.u32 %v809_v41, %v624_v40  ;;  %v99_v48 = vld [vmem:[%s1200_s2 + $0x18] sm:$0xff]  ;;  %v102_v49 = vld [vmem:[%s1200_s2 + $0x30] sm:$0xff] }
  0x10   :  { %477 = vmatpush.bf16.msra.mxu2 %v842_v15  ;;  %v629_v47 = vor.u32 %v807_v42, %v626_v43  ;;  %121 = vperm.xlu1 %879, %v99_v48   ;;  %v103_v50 = vld [vmem:[%s1200_s2 + $0x38] sm:$0xff]  ;;  %v632_v51 = vld [vmem:[%s1201_s1 + $0x20] sm:$0xf]  ;;  %v812_v52 = vld [vmem:[%s1201_s1 + $0x2c] sm:$0xf0] }
  0x11   :  { %506 = vmatpush.bf16.msra.mxu3 %v850_v16  ;;  %v810_v53 = vld [vmem:[%s1201_s1 + $0x24] sm:$0xf]  ;;  %v634_v54 = vld [vmem:[%s1201_s1 + $0x30] sm:$0xf0]  ;;  %v640_v55 = vld [vmem:[%s1201_s1 + $0x28] sm:$0xf]  ;;  %v633_v59 = vor.u32 %v812_v52, %v632_v51 }
  0x12   :  { %420 = vmatpush.bf16.msra.mxu0 %v825_v18  ;;  %111 = vperm.xlu0 %878, %v97_v27   ;;  %v813_v56 = vld [vmem:[%s1201_s1 + $0x34] sm:$0xf0]  ;;  %v811_v57 = vld [vmem:[%s1201_s1 + $0x2c] sm:$0xf]  ;;  %v642_v58 = vld [vmem:[%s1201_s1 + $0x38] sm:$0xf0]  ;;  %v637_v60 = vor.u32 %v810_v53, %v634_v54 }
  0x13   :  { %449 = vmatpush.bf16.msra.mxu1 %v833_v19  ;;  %v641_v61 = vor.u32 %v813_v56, %v640_v55  ;;  %v645_v62 = vor.u32 %v811_v57, %v642_v58  ;;  %v100_v63 = vld [vmem:[%s1200_s2 + $0x20] sm:$0xff]  ;;  %v101_v0 = vld [vmem:[%s1200_s2 + $0x28] sm:$0xff]  ;;  %v816_v2 = vld [vmem:[%s1201_s1 + $0x4c] sm:$0xf0] }
  0x14   :  { %478 = vmatpush.bf16.msra.mxu2 %v841_v20  ;;  %126 = vperm.xlu2 %880, %v100_v63   ;;  %v648_v1 = vld [vmem:[%s1201_s1 + $0x40] sm:$0xf]  ;;  %v814_v3 = vld [vmem:[%s1201_s1 + $0x44] sm:$0xf]  ;;  %v650_v4 = vld [vmem:[%s1201_s1 + $0x50] sm:$0xf0] }
  0x15   :  { %507 = vmatpush.bf16.msra.mxu3 %v849_v21  ;;  %v656_v5 = vld [vmem:[%s1201_s1 + $0x48] sm:$0xf]  ;;  %v817_v6 = vld [vmem:[%s1201_s1 + $0x54] sm:$0xf0]  ;;  %v815_v7 = vld [vmem:[%s1201_s1 + $0x4c] sm:$0xf]  ;;  %v649_v9 = vor.u32 %v816_v2, %v648_v1  ;;  %v653_v10 = vor.u32 %v814_v3, %v650_v4 }
  0x16   :  { %421 = vmatpush.bf16.msra.mxu0 %v824_v22  ;;  %v658_v8 = vld [vmem:[%s1201_s1 + $0x58] sm:$0xf0]  ;;  %v657_v11 = vor.u32 %v817_v6, %v656_v5  ;;  %v664_v13 = vld [vmem:[%s1201_s1 + $0x60] sm:$0xf]  ;;  %v820_v14 = vld [vmem:[%s1201_s1 + $0x6c] sm:$0xf0] }
  0x17   :  { %450 = vmatpush.bf16.msra.mxu1 %v832_v23  ;;  %v661_v12 = vor.u32 %v815_v7, %v658_v8  ;;  %v818_v15 = vld [vmem:[%s1201_s1 + $0x64] sm:$0xf]  ;;  %v666_v16 = vld [vmem:[%s1201_s1 + $0x70] sm:$0xf0]  ;;  %v672_v17 = vld [vmem:[%s1201_s1 + $0x68] sm:$0xf]  ;;  %v665_v21 = vor.u32 %v820_v14, %v664_v13 }
  0x18   :  { %479 = vmatpush.bf16.msra.mxu2 %v840_v25  ;;  %141 = vperm.xlu1 %879, %v103_v50   ;;  %v821_v18 = vld [vmem:[%s1201_s1 + $0x74] sm:$0xf0]  ;;  %v819_v19 = vld [vmem:[%s1201_s1 + $0x6c] sm:$0xf]  ;;  %v674_v20 = vld [vmem:[%s1201_s1 + $0x78] sm:$0xf0]  ;;  %v669_v22 = vor.u32 %v818_v15, %v666_v16 }
  0x19   :  { %508 = vmatpush.bf16.msra.mxu3 %v848_v26  ;;  %v673_v23 = vor.u32 %v821_v18, %v672_v17  ;;  %v677_v24 = vor.u32 %v819_v19, %v674_v20 }
  0x1a   :  { %422 = vmatpush.bf16.msra.mxu0 %v823_v28  ;;  %136 = vperm.xlu0 %878, %v102_v49  }
  0x1b   :  { %451 = vmatpush.bf16.msra.mxu1 %v831_v29 }
  0x1c   :  { %480 = vmatpush.bf16.msra.mxu2 %v839_v30  ;;  %131 = vperm.xlu2 %880, %v101_v0  }
  0x1d   :  { %509 = vmatpush.bf16.msra.mxu3 %v847_v31 }
  0x1e   :  { %423 = vmatpush.bf16.msra.mxu0 %v822_v32 }
  0x1f   :  { %452 = vmatpush.bf16.msra.mxu1 %v830_v33 }
  0x20   :  { %481 = vmatpush.bf16.msra.mxu2 %v838_v34 }
  0x21   :  { %510 = vmatpush.bf16.msra.mxu3 %v846_v35  ;;  %424 = vmatmul.bf16.vlgmr.msra.gmra.mxu0 %v617_v44 }
  0x22   :  { %453 = vmatmul.bf16.vlgmr.msra.gmra.mxu1 %v621_v45 }
  0x23   :  { %482 = vmatmul.bf16.vlgmr.msra.gmra.mxu2 %v625_v46 }
  0x24   :  { %511 = vmatmul.bf16.vlgmr.msra.gmra.mxu3 %v629_v47 }
  0x31   :  { %429 = vmatmul.bf16.gmra.mxu0 %v633_v59 }
  0x32   :  { %458 = vmatmul.bf16.gmra.mxu1 %v637_v60 }
  0x33   :  { %487 = vmatmul.bf16.gmra.mxu2 %v641_v61 }
  0x34   :  { %516 = vmatmul.bf16.gmra.mxu3 %v645_v62 }
  0x41   :  { %434 = vmatmul.bf16.gmra.mxu0 %v649_v9 }
  0x42   :  { %463 = vmatmul.bf16.gmra.mxu1 %v653_v10 }
  0x43   :  { %492 = vmatmul.bf16.gmra.mxu2 %v657_v11 }
  0x44   :  { %521 = vmatmul.bf16.gmra.mxu3 %v661_v12 }
  0x51   :  { %439 = vmatmul.bf16.gmra.mxu0 %v665_v21 }
  0x52   :  { %468 = vmatmul.bf16.gmra.mxu1 %v669_v22 }
  0x53   :  { %497 = vmatmul.bf16.gmra.mxu2 %v673_v23 }
  0x54   :  { %526 = vmatmul.bf16.gmra.mxu3 %v677_v24 }
  0x6e   :  { %v127_v60 = vpop.permute.xlu2 %126 }
  0x76   :  { %v132_v8 = vpop.permute.xlu2 %131 }
  0x7a   :  { %v117_v39 = vpop.permute.xlu1 %116 }
  0x7c   :  { %v107_v25 = vpop.permute.xlu0 %106 }
  0x82   :  { %v122_v51 = vpop.permute.xlu1 %121 }
  0x84   :  { %v112_v30 = vpop.permute.xlu0 %111 }
  0x8c   :  { %v137_v22 = vpop.permute.xlu0 %136 }
  0x9e   :  { %v425_v26 = vpop.f32.mrf.mxu0 }
  0x9f   :  { %v454_v27 = vpop.f32.mrf.mxu1  ;;  %v426_v28 = vadd.f32 %v425_v26, %v107_v25 }
  0xa1   :  { %v455_v29 = vadd.f32 %v454_v27, %v426_v28 }
  0xa6   :  { %v483_v31 = vpop.f32.mrf.mxu2  ;;  %v427_v34 = vpop.f32.mrf.mxu0 }
  0xa7   :  { %v512_v32 = vpop.f32.mrf.mxu3  ;;  %v484_v33 = vadd.f32 %v483_v31, %v455_v29  ;;  %v456_v35 = vpop.f32.mrf.mxu1  ;;  %v428_v37 = vadd.f32 %v427_v34, %v112_v30 }
  0xa9   :  { %v513_v36 = vadd.f32 %v512_v32, %v484_v33  ;;  %v457_v40 = vadd.f32 %v456_v35, %v428_v37  ;;  %v142_v32 = vpop.permute.xlu1 %141 }
  0xab   :  { %532 = vadd.xlane.f32.xlu2 %v513_v36  ;;  %v557_v38 = vmul.f32 %v513_v36, %v513_v36 }
  0xad   :  { %565 = vadd.xlane.f32.xlu0 %v557_v38 }
  0xae   :  { %v485_v41 = vpop.f32.mrf.mxu2  ;;  %v430_v44 = vpop.f32.mrf.mxu0 }
  0xaf   :  { %v514_v42 = vpop.f32.mrf.mxu3  ;;  %v486_v43 = vadd.f32 %v485_v41, %v457_v40  ;;  %v459_v45 = vpop.f32.mrf.mxu1  ;;  %v431_v46 = vadd.f32 %v430_v44, %v117_v39 }
  0xb1   :  { %v515_v47 = vadd.f32 %v514_v42, %v486_v43  ;;  %v460_v49 = vadd.f32 %v459_v45, %v431_v46 }
  0xb3   :  { %v857_v48 = vpack.c.bf16 %v515_v47, %v513_v36  ;;  %v558_v50 = vmul.f32 %v515_v47, %v515_v47 }
  0xb5   :  { %858 = vst [vmem:[%s1202_s3] sm:$0xff] %v857_v48   ;;  %567 = vadd.xlane.f32.xlu1 %v558_v50  ;;  %534 = vadd.xlane.f32.xlu0 %v515_v47 }
  0xb6   :  { %v488_v52 = vpop.f32.mrf.mxu2  ;;  %v432_v55 = vpop.f32.mrf.mxu0 }
  0xb7   :  { %v517_v53 = vpop.f32.mrf.mxu3  ;;  %v489_v54 = vadd.f32 %v488_v52, %v460_v49  ;;  %v461_v56 = vpop.f32.mrf.mxu1  ;;  %v433_v58 = vadd.f32 %v432_v55, %v122_v51 }
  0xb9   :  { %v518_v57 = vadd.f32 %v517_v53, %v489_v54  ;;  %v462_v61 = vadd.f32 %v461_v56, %v433_v58 }
  0xbb   :  { %v559_v59 = vmul.f32 %v518_v57, %v518_v57 }
  0xbd   :  { %536 = vadd.xlane.f32.xlu1 %v518_v57  ;;  %569 = vadd.xlane.f32.xlu2 %v559_v59 }
  0xbe   :  { %v490_v62 = vpop.f32.mrf.mxu2  ;;  %v435_v1 = vpop.f32.mrf.mxu0 }
  0xbf   :  { %v519_v63 = vpop.f32.mrf.mxu3  ;;  %v491_v0 = vadd.f32 %v490_v62, %v462_v61  ;;  %v464_v2 = vpop.f32.mrf.mxu1  ;;  %v436_v3 = vadd.f32 %v435_v1, %v127_v60 }
  0xc1   :  { %v520_v4 = vadd.f32 %v519_v63, %v491_v0  ;;  %v465_v6 = vadd.f32 %v464_v2, %v436_v3 }
  0xc3   :  { %v862_v5 = vpack.c.bf16 %v520_v4, %v518_v57  ;;  %v560_v7 = vmul.f32 %v520_v4, %v520_v4 }
  0xc5   :  { %874 = vst [vmem:[%s1202_s3 + $0x8] sm:$0xff] %v862_v5   ;;  %538 = vadd.xlane.f32.xlu2 %v520_v4  ;;  %571 = vadd.xlane.f32.xlu0 %v560_v7 }
  0xc6   :  { %v493_v9 = vpop.f32.mrf.mxu2  ;;  %v437_v12 = vpop.f32.mrf.mxu0 }
  0xc7   :  { %v522_v10 = vpop.f32.mrf.mxu3  ;;  %v494_v11 = vadd.f32 %v493_v9, %v465_v6  ;;  %v466_v13 = vpop.f32.mrf.mxu1  ;;  %v438_v15 = vadd.f32 %v437_v12, %v132_v8 }
  0xc9   :  { %v523_v14 = vadd.f32 %v522_v10, %v494_v11  ;;  %v467_v17 = vadd.f32 %v466_v13, %v438_v15 }
  0xcb   :  { %v561_v16 = vmul.f32 %v523_v14, %v523_v14 }
  0xcd   :  { %573 = vadd.xlane.f32.xlu1 %v561_v16  ;;  %540 = vadd.xlane.f32.xlu2 %v523_v14 }
  0xce   :  { %v495_v18 = vpop.f32.mrf.mxu2  ;;  %v440_v21 = vpop.f32.mrf.mxu0 }
  0xcf   :  { %v524_v19 = vpop.f32.mrf.mxu3  ;;  %v496_v20 = vadd.f32 %v495_v18, %v467_v17  ;;  %v441_v24 = vadd.f32 %v440_v21, %v137_v22  ;;  %v469_v25 = vpop.f32.mrf.mxu1 }
  0xd1   :  { %v525_v23 = vadd.f32 %v524_v19, %v496_v20  ;;  %v470_v27 = vadd.f32 %v469_v25, %v441_v24 }
  0xd3   :  { %v867_v26 = vpack.c.bf16 %v525_v23, %v523_v14  ;;  %542 = vadd.xlane.f32.xlu0 %v525_v23  ;;  %v562_v44 = vmul.f32 %v525_v23, %v525_v23 }
  0xd5   :  { %875 = vst [vmem:[%s1202_s3 + $0x10] sm:$0xff] %v867_v26  }
  0xd6   :  { %v498_v28 = vpop.f32.mrf.mxu2  ;;  %v442_v31 = vpop.f32.mrf.mxu0 }
  0xd7   :  { %v527_v29 = vpop.f32.mrf.mxu3  ;;  %v499_v30 = vadd.f32 %v498_v28, %v470_v27  ;;  %v443_v34 = vadd.f32 %v442_v31, %v142_v32  ;;  %v471_v36 = vpop.f32.mrf.mxu1 }
  0xd9   :  { %v528_v33 = vadd.f32 %v527_v29, %v499_v30  ;;  %v472_v37 = vadd.f32 %v471_v36, %v443_v34 }
  0xdb   :  { %544 = vadd.xlane.f32.xlu1 %v528_v33  ;;  %v563_v35 = vmul.f32 %v528_v33, %v528_v33 }
  0xdd   :  { %577 = vadd.xlane.f32.xlu0 %v563_v35 }
  0xde   :  { %v500_v38 = vpop.f32.mrf.mxu2 }
  0xdf   :  { %v501_v39 = vadd.f32 %v500_v38, %v472_v37  ;;  %v529_v40 = vpop.f32.mrf.mxu3 }
  0xe1   :  { %v530_v41 = vadd.f32 %v529_v40, %v501_v39 }
  0xe3   :  { %v872_v42 = vpack.c.bf16 %v530_v41, %v528_v33  ;;  %546 = vadd.xlane.f32.xlu2 %v530_v41  ;;  %v564_v43 = vmul.f32 %v530_v41, %v530_v41 }
  0xe5   :  { %876 = vst [vmem:[%s1202_s3 + $0x18] sm:$0xff] %v872_v42   ;;  %579 = vadd.xlane.f32.xlu1 %v564_v43 }
  0xeb   :  { %575 = vadd.xlane.f32.xlu2 %v562_v44 }
 0x11e   :  { %v533_v45 = vpop.xlane.xlu2 %532 }
 0x11f   :  { %549 = vst.msk [vmem:[%s1203_s4] sm:$0xff] %vm548_vm0, %v533_v45 }
 0x120   :  { %v566_v46 = vpop.xlane.xlu0 %565 }
 0x121   :  { %582 = vst.msk [vmem:[%s1203_s4] sm:$0xff] %vm581_vm1, %v566_v46 }
 0x128   :  { %v568_v47 = vpop.xlane.xlu1 %567  ;;  %v535_v48 = vpop.xlane.xlu0 %534 }
 0x129   :  { %550 = vst.msk [vmem:[%s1203_s4 + $0x8] sm:$0xff] %vm548_vm0, %v535_v48 }
 0x12a   :  { %583 = vst.msk [vmem:[%s1203_s4 + $0x8] sm:$0xff] %vm581_vm1, %v568_v47 }
 0x130   :  { %v537_v49 = vpop.xlane.xlu1 %536  ;;  %v570_v50 = vpop.xlane.xlu2 %569 }
 0x131   :  { %551 = vst.msk [vmem:[%s1203_s4 + $0x10] sm:$0xff] %vm548_vm0, %v537_v49 }
 0x132   :  { %584 = vst.msk [vmem:[%s1203_s4 + $0x10] sm:$0xff] %vm581_vm1, %v570_v50 }
 0x138   :  { %v539_v51 = vpop.xlane.xlu2 %538  ;;  %v572_v52 = vpop.xlane.xlu0 %571 }
 0x139   :  { %552 = vst.msk [vmem:[%s1203_s4 + $0x18] sm:$0xff] %vm548_vm0, %v539_v51 }
 0x13a   :  { %585 = vst.msk [vmem:[%s1203_s4 + $0x18] sm:$0xff] %vm581_vm1, %v572_v52 }
 0x140   :  { %v574_v53 = vpop.xlane.xlu1 %573  ;;  %v541_v54 = vpop.xlane.xlu2 %540 }
 0x141   :  { %553 = vst.msk [vmem:[%s1203_s4 + $0x20] sm:$0xff] %vm548_vm0, %v541_v54 }
 0x142   :  { %586 = vst.msk [vmem:[%s1203_s4 + $0x20] sm:$0xff] %vm581_vm1, %v574_v53 }
 0x146   :  { %v543_v55 = vpop.xlane.xlu0 %542 }
 0x147   :  { %554 = vst.msk [vmem:[%s1203_s4 + $0x28] sm:$0xff] %vm548_vm0, %v543_v55 }
 0x14e   :  { %v545_v56 = vpop.xlane.xlu1 %544 }
 0x14f   :  { %555 = vst.msk [vmem:[%s1203_s4 + $0x30] sm:$0xff] %vm548_vm0, %v545_v56 }
 0x150   :  { %v578_v57 = vpop.xlane.xlu0 %577 }
 0x151   :  { %588 = vst.msk [vmem:[%s1203_s4 + $0x30] sm:$0xff] %vm581_vm1, %v578_v57 }
 0x156   :  { %v547_v58 = vpop.xlane.xlu2 %546 }
 0x157   :  { %556 = vst.msk [vmem:[%s1203_s4 + $0x38] sm:$0xff] %vm548_vm0, %v547_v58 }
 0x158   :  { %v580_v59 = vpop.xlane.xlu1 %579 }
 0x159   :  { %589 = vst.msk [vmem:[%s1203_s4 + $0x38] sm:$0xff] %vm581_vm1, %v580_v59 }
 0x15e   :  { %v576_v60 = vpop.xlane.xlu2 %575 }
 0x15f   :  { %587 = vst.msk [vmem:[%s1203_s4 + $0x28] sm:$0xff] %vm581_vm1, %v576_v60 }

// kernel: multiscale_discriminator_forward.31
= control target key start
LH: loop header
LB: loop body
LE: loop exit
PB: predicated region body
PF: predicated region fallthrough
CT: control target
= control target key end

     0   :  { %v985_v30 = vmov 0   ;;  %s1207_s0 = inlined_call_operand.vmem [shape: bf16[1024,128], index: 0, kind: input, shape index: {}]   ;;  %s1208_s1 = inlined_call_operand.vmem [shape: bf16[1,1024], index: 1, kind: input, shape index: {}]   ;;  %s1209_s2 = inlined_call_operand.<no memory space> [shape: f32[1,1], index: 2, kind: input, shape index: {}]   ;;  %s1210_s3 = inlined_call_operand.vmem [shape: f32[1,128], index: 3, kind: output, shape index: {}]  }
   0x1   :  { %v926_v0 = vld [vmem:[%s1207_s0 + $0x38] sm:$0xff]  ;;  %v925_v4 = vld [vmem:[%s1207_s0 + $0x30] sm:$0xff]  ;;  %v924_v8 = vld [vmem:[%s1207_s0 + $0x28] sm:$0xff]  ;;  %v8_v21 = vstv %s1209_s2  ;;  %984 = vset.pattern.permute.xlu0 %v985_v30 }
   0x2   :  { %v934_v1 = vld [vmem:[%s1207_s0 + $0x78] sm:$0xff]  ;;  %554 = vmatpush.bf16.msra.mxu0 %v926_v0  ;;  %v933_v5 = vld [vmem:[%s1207_s0 + $0x70] sm:$0xff]  ;;  %v932_v9 = vld [vmem:[%s1207_s0 + $0x68] sm:$0xff]  ;;  %9 = vst [vmem:[#allocation2] sm:$0x1] %v8_v21 }
   0x3   :  { %v942_v2 = vld [vmem:[%s1207_s0 + $0xb8] sm:$0xff]  ;;  %567 = vmatpush.bf16.msra.mxu1 %v934_v1  ;;  %v941_v6 = vld [vmem:[%s1207_s0 + $0xb0] sm:$0xff]  ;;  %v940_v10 = vld [vmem:[%s1207_s0 + $0xa8] sm:$0xff] }
   0x4   :  { %v950_v3 = vld [vmem:[%s1207_s0 + $0xf8] sm:$0xff]  ;;  %580 = vmatpush.bf16.msra.mxu2 %v942_v2  ;;  %v949_v7 = vld [vmem:[%s1207_s0 + $0xf0] sm:$0xff]  ;;  %v948_v11 = vld [vmem:[%s1207_s0 + $0xe8] sm:$0xff] }
   0x5   :  { %593 = vmatpush.bf16.msra.mxu3 %v950_v3  ;;  %v923_v12 = vld [vmem:[%s1207_s0 + $0x20] sm:$0xff]  ;;  %v922_v17 = vld [vmem:[%s1207_s0 + $0x18] sm:$0xff]  ;;  %v921_v22 = vld [vmem:[%s1207_s0 + $0x10] sm:$0xff] }
   0x6   :  { %555 = vmatpush.bf16.msra.mxu0 %v925_v4  ;;  %v931_v13 = vld [vmem:[%s1207_s0 + $0x60] sm:$0xff]  ;;  %v930_v18 = vld [vmem:[%s1207_s0 + $0x58] sm:$0xff]  ;;  %v929_v23 = vld [vmem:[%s1207_s0 + $0x50] sm:$0xff] }
   0x7   :  { %568 = vmatpush.bf16.msra.mxu1 %v933_v5  ;;  %v939_v14 = vld [vmem:[%s1207_s0 + $0xa0] sm:$0xff]  ;;  %v938_v19 = vld [vmem:[%s1207_s0 + $0x98] sm:$0xff]  ;;  %v937_v24 = vld [vmem:[%s1207_s0 + $0x90] sm:$0xff] }
   0x8   :  { %581 = vmatpush.bf16.msra.mxu2 %v941_v6  ;;  %v947_v15 = vld [vmem:[%s1207_s0 + $0xe0] sm:$0xff]  ;;  %v946_v20 = vld [vmem:[%s1207_s0 + $0xd8] sm:$0xff]  ;;  %v945_v25 = vld [vmem:[%s1207_s0 + $0xd0] sm:$0xff] }
   0x9   :  { %594 = vmatpush.bf16.msra.mxu3 %v949_v7  ;;  %v16_v16 = vld [vmem:[%s1208_s1] sm:$0xff]  ;;  %v920_v26 = vld [vmem:[%s1207_s0 + $0x8] sm:$0xff]  ;;  %v958_v36 = vld [vmem:[%s1207_s0 + $0x138] sm:$0xff] }
   0xa   :  { %556 = vmatpush.bf16.msra.mxu0 %v924_v8  ;;  %153 = vst [vmem:[#allocation1] ss:$9 sm:$0xff] %v16_v16  ;;  %v928_v27 = vld [vmem:[%s1207_s0 + $0x48] sm:$0xff]  ;;  %v919_v32 = vld [vmem:[%s1207_s0] sm:$0xff]  ;;  %v966_v37 = vld [vmem:[%s1207_s0 + $0x178] sm:$0xff] }
   0xb   :  { %569 = vmatpush.bf16.msra.mxu1 %v932_v9  ;;  %v936_v28 = vld [vmem:[%s1207_s0 + $0x88] sm:$0xff]  ;;  %v927_v33 = vld [vmem:[%s1207_s0 + $0x40] sm:$0xff]  ;;  %v974_v38 = vld [vmem:[%s1207_s0 + $0x1b8] sm:$0xff] }
   0xc   :  { %582 = vmatpush.bf16.msra.mxu2 %v940_v10  ;;  %v944_v29 = vld [vmem:[%s1207_s0 + $0xc8] sm:$0xff]  ;;  %v935_v34 = vld [vmem:[%s1207_s0 + $0x80] sm:$0xff]  ;;  %v982_v39 = vld [vmem:[%s1207_s0 + $0x1f8] sm:$0xff] }
   0xd   :  { %595 = vmatpush.bf16.msra.mxu3 %v948_v11  ;;  %v145_v31 = vld [vmem:[#allocation2] sm:$0x1]  ;;  %v943_v35 = vld [vmem:[%s1207_s0 + $0xc0] sm:$0xff]  ;;  %v957_v40 = vld [vmem:[%s1207_s0 + $0x130] sm:$0xff] }
   0xe   :  { %557 = vmatpush.bf16.msra.mxu0 %v923_v12  ;;  %148 = vperm.xlu0 %984, %v145_v31   ;;  %v965_v43 = vld [vmem:[%s1207_s0 + $0x170] sm:$0xff]  ;;  %v956_v48 = vld [vmem:[%s1207_s0 + $0x128] sm:$0xff]  ;;  %v955_v52 = vld [vmem:[%s1207_s0 + $0x120] sm:$0xff] }
   0xf   :  { %570 = vmatpush.bf16.msra.mxu1 %v931_v13  ;;  %v973_v46 = vld [vmem:[%s1207_s0 + $0x1b0] sm:$0xff]  ;;  %v964_v49 = vld [vmem:[%s1207_s0 + $0x168] sm:$0xff]  ;;  %v963_v53 = vld [vmem:[%s1207_s0 + $0x160] sm:$0xff] }
  0x10   :  { %583 = vmatpush.bf16.msra.mxu2 %v939_v14  ;;  %v981_v47 = vld [vmem:[%s1207_s0 + $0x1f0] sm:$0xff]  ;;  %v972_v50 = vld [vmem:[%s1207_s0 + $0x1a8] sm:$0xff]  ;;  %v971_v54 = vld [vmem:[%s1207_s0 + $0x1a0] sm:$0xff] }
  0x11   :  { %596 = vmatpush.bf16.msra.mxu3 %v947_v15  ;;  %v156_v41 = vld [vmem:[#allocation1 + $0x12] sm:$0xff]  ;;  %v157_v42 = vld [vmem:[#allocation1 + $0x1b] sm:$0xff]  ;;  %v155_v45 = vld [vmem:[#allocation1 + $0x9] sm:$0xff] }
  0x12   :  { %558 = vmatpush.bf16.msra.mxu0 %v922_v17  ;;  %v154_v44 = vld [vmem:[#allocation1] sm:$0xff]  ;;  %v980_v51 = vld [vmem:[%s1207_s0 + $0x1e8] sm:$0xff]  ;;  %v954_v56 = vld [vmem:[%s1207_s0 + $0x118] sm:$0xff] }
  0x13   :  { %571 = vmatpush.bf16.msra.mxu1 %v930_v18  ;;  %v979_v55 = vld [vmem:[%s1207_s0 + $0x1e0] sm:$0xff]  ;;  %v962_v57 = vld [vmem:[%s1207_s0 + $0x158] sm:$0xff]  ;;  %v953_v60 = vld [vmem:[%s1207_s0 + $0x110] sm:$0xff] }
  0x14   :  { %584 = vmatpush.bf16.msra.mxu2 %v938_v19  ;;  %v970_v58 = vld [vmem:[%s1207_s0 + $0x198] sm:$0xff]  ;;  %v961_v61 = vld [vmem:[%s1207_s0 + $0x150] sm:$0xff]  ;;  %v952_v0 = vld [vmem:[%s1207_s0 + $0x108] sm:$0xff] }
  0x15   :  { %597 = vmatpush.bf16.msra.mxu3 %v946_v20  ;;  %v978_v59 = vld [vmem:[%s1207_s0 + $0x1d8] sm:$0xff]  ;;  %v969_v62 = vld [vmem:[%s1207_s0 + $0x190] sm:$0xff]  ;;  %v960_v1 = vld [vmem:[%s1207_s0 + $0x148] sm:$0xff] }
  0x16   :  { %559 = vmatpush.bf16.msra.mxu0 %v921_v22  ;;  %v977_v63 = vld [vmem:[%s1207_s0 + $0x1d0] sm:$0xff]  ;;  %v968_v2 = vld [vmem:[%s1207_s0 + $0x188] sm:$0xff]  ;;  %v951_v4 = vld [vmem:[%s1207_s0 + $0x100] sm:$0xff] }
  0x17   :  { %572 = vmatpush.bf16.msra.mxu1 %v929_v23  ;;  %v976_v3 = vld [vmem:[%s1207_s0 + $0x1c8] sm:$0xff]  ;;  %v959_v5 = vld [vmem:[%s1207_s0 + $0x140] sm:$0xff]  ;;  %v160_v10 = vld [vmem:[#allocation1 + $0x36] sm:$0xff] }
  0x18   :  { %585 = vmatpush.bf16.msra.mxu2 %v937_v24  ;;  %v967_v6 = vld [vmem:[%s1207_s0 + $0x180] sm:$0xff]  ;;  %v159_v9 = vld [vmem:[#allocation1 + $0x2d] sm:$0xff] }
  0x19   :  { %598 = vmatpush.bf16.msra.mxu3 %v945_v25  ;;  %v975_v7 = vld [vmem:[%s1207_s0 + $0x1c0] sm:$0xff] }
  0x1a   :  { %560 = vmatpush.bf16.msra.mxu0 %v920_v26  ;;  %v158_v8 = vld [vmem:[#allocation1 + $0x24] sm:$0xff] }
  0x1b   :  { %573 = vmatpush.bf16.msra.mxu1 %v928_v27  ;;  %v161_v11 = vld [vmem:[#allocation1 + $0x3f] sm:$0xff] }
  0x1c   :  { %586 = vmatpush.bf16.msra.mxu2 %v936_v28 }
  0x1d   :  { %599 = vmatpush.bf16.msra.mxu3 %v944_v29 }
  0x1e   :  { %561 = vmatpush.bf16.msra.mxu0 %v919_v32 }
  0x1f   :  { %574 = vmatpush.bf16.msra.mxu1 %v927_v33 }
  0x20   :  { %587 = vmatpush.bf16.msra.mxu2 %v935_v34 }
  0x21   :  { %600 = vmatpush.bf16.msra.mxu3 %v943_v35  ;;  %562 = vmatmul.bf16.vlgmr.msra.gmra.mxu0 %v154_v44 }
  0x22   :  { %606 = vmatpush.bf16.msrb.mxu0 %v958_v36  ;;  %575 = vmatmul.bf16.vlgmr.msra.gmra.mxu1 %v155_v45 }
  0x23   :  { %619 = vmatpush.bf16.msrb.mxu1 %v966_v37  ;;  %588 = vmatmul.bf16.vlgmr.msra.gmra.mxu2 %v156_v41 }
  0x24   :  { %632 = vmatpush.bf16.msrb.mxu2 %v974_v38  ;;  %601 = vmatmul.bf16.vlgmr.msra.gmra.mxu3 %v157_v42 }
  0x25   :  { %645 = vmatpush.bf16.msrb.mxu3 %v982_v39 }
  0x26   :  { %607 = vmatpush.bf16.msrb.mxu0 %v957_v40 }
  0x27   :  { %620 = vmatpush.bf16.msrb.mxu1 %v965_v43 }
  0x28   :  { %633 = vmatpush.bf16.msrb.mxu2 %v973_v46 }
  0x29   :  { %646 = vmatpush.bf16.msrb.mxu3 %v981_v47 }
  0x2a   :  { %608 = vmatpush.bf16.msrb.mxu0 %v956_v48 }
  0x2b   :  { %621 = vmatpush.bf16.msrb.mxu1 %v964_v49 }
  0x2c   :  { %634 = vmatpush.bf16.msrb.mxu2 %v972_v50 }
  0x2d   :  { %647 = vmatpush.bf16.msrb.mxu3 %v980_v51 }
  0x2e   :  { %609 = vmatpush.bf16.msrb.mxu0 %v955_v52 }
  0x2f   :  { %622 = vmatpush.bf16.msrb.mxu1 %v963_v53 }
  0x30   :  { %635 = vmatpush.bf16.msrb.mxu2 %v971_v54 }
  0x31   :  { %648 = vmatpush.bf16.msrb.mxu3 %v979_v55 }
  0x32   :  { %610 = vmatpush.bf16.msrb.mxu0 %v954_v56 }
  0x33   :  { %623 = vmatpush.bf16.msrb.mxu1 %v962_v57 }
  0x34   :  { %636 = vmatpush.bf16.msrb.mxu2 %v970_v58 }
  0x35   :  { %649 = vmatpush.bf16.msrb.mxu3 %v978_v59 }
  0x36   :  { %611 = vmatpush.bf16.msrb.mxu0 %v953_v60 }
  0x37   :  { %624 = vmatpush.bf16.msrb.mxu1 %v961_v61 }
  0x38   :  { %637 = vmatpush.bf16.msrb.mxu2 %v969_v62 }
  0x39   :  { %650 = vmatpush.bf16.msrb.mxu3 %v977_v63 }
  0x3a   :  { %612 = vmatpush.bf16.msrb.mxu0 %v952_v0 }
  0x3b   :  { %625 = vmatpush.bf16.msrb.mxu1 %v960_v1 }
  0x3c   :  { %638 = vmatpush.bf16.msrb.mxu2 %v968_v2 }
  0x3d   :  { %651 = vmatpush.bf16.msrb.mxu3 %v976_v3 }
  0x3e   :  { %613 = vmatpush.bf16.msrb.mxu0 %v951_v4 }
  0x3f   :  { %626 = vmatpush.bf16.msrb.mxu1 %v959_v5 }
  0x40   :  { %639 = vmatpush.bf16.msrb.mxu2 %v967_v6 }
  0x41   :  { %652 = vmatpush.bf16.msrb.mxu3 %v975_v7  ;;  %614 = vmatmul.bf16.vlgmr.msrb.gmra.mxu0 %v158_v8 }
  0x42   :  { %627 = vmatmul.bf16.vlgmr.msrb.gmra.mxu1 %v159_v9 }
  0x43   :  { %640 = vmatmul.bf16.vlgmr.msrb.gmra.mxu2 %v160_v10 }
  0x44   :  { %653 = vmatmul.bf16.vlgmr.msrb.gmra.mxu3 %v161_v11 }
  0x80   :  { %v149_v18 = vpop.permute.xlu0 %148 }
  0x81   :  { %v151_v19 = vperm.slane %v149_v18, 0 }
  0x9e   :  { %v563_v12 = vpop.f32.mrf.mxu0 }
  0x9f   :  { %v576_v13 = vpop.f32.mrf.mxu1  ;;  %v564_v22 = vadd.f32 %v563_v12, %v151_v19 }
  0xa1   :  { %v577_v23 = vadd.f32 %v576_v13, %v564_v22 }
  0xa6   :  { %v589_v14 = vpop.f32.mrf.mxu2  ;;  %v565_v16 = vpop.f32.mrf.mxu0 }
  0xa7   :  { %v602_v15 = vpop.f32.mrf.mxu3  ;;  %v578_v17 = vpop.f32.mrf.mxu1  ;;  %v590_v24 = vadd.f32 %v589_v14, %v577_v23 }
  0xa9   :  { %v603_v25 = vadd.f32 %v602_v15, %v590_v24 }
  0xae   :  { %v591_v20 = vpop.f32.mrf.mxu2 }
  0xaf   :  { %v604_v21 = vpop.f32.mrf.mxu3 }
  0xbe   :  { %v615_v26 = vpop.f32.mrf.mxu0 }
  0xbf   :  { %v628_v27 = vpop.f32.mrf.mxu1  ;;  %v616_v28 = vadd.f32 %v615_v26, %v603_v25 }
  0xc1   :  { %v629_v29 = vadd.f32 %v628_v27, %v616_v28 }
  0xc6   :  { %v641_v30 = vpop.f32.mrf.mxu2  ;;  %v617_v33 = vpop.f32.mrf.mxu0 }
  0xc7   :  { %v654_v31 = vpop.f32.mrf.mxu3  ;;  %v642_v32 = vadd.f32 %v641_v30, %v629_v29  ;;  %v630_v34 = vpop.f32.mrf.mxu1 }
  0xc9   :  { %v655_v35 = vadd.f32 %v654_v31, %v642_v32 }
  0xcb   :  { %658 = vst [vmem:[%s1210_s3] sm:$0x1] %v655_v35 }
  0xce   :  { %v643_v36 = vpop.f32.mrf.mxu2 }
  0xcf   :  { %v656_v37 = vpop.f32.mrf.mxu3 }

// kernel: multiscale_discriminator_forward.32
= control target key start
LH: loop header
LB: loop body
LE: loop exit
PB: predicated region body
PF: predicated region fallthrough
CT: control target
= control target key end

     0   :  { %v102_v1 = vmov 0   ;;  %vm54_vm0 = vcmask 523264   ;;  %s144_s0 = inlined_call_operand.vmem [shape: bf16[64,128], index: 0, kind: input, shape index: {}]   ;;  %s145_s2 = inlined_call_operand.vmem [shape: f32[8,1], index: 2, kind: input, shape index: {}]   ;;  %s146_s1 = inlined_call_operand.vmem [shape: bf16[8,64], index: 1, kind: input, shape index: {}]   ;;  %s147_s3 = inlined_call_operand.vmem [shape: f32[8,128], index: 3, kind: output, shape index: {}]  }
   0x1   :  { %v99_v0 = vld [vmem:[%s144_s0 + $0x18] sm:$0xff]  ;;  %101 = vset.pattern.permute.xlu0 %v102_v1  ;;  %v24_v2 = vld [vmem:[%s145_s2] sm:$0xff]  ;;  %v98_v3 = vld [vmem:[%s144_s0 + $0x10] sm:$0xff] }
   0x2   :  { %62 = vmatpush.bf16.msra.mxu0 %v99_v0  ;;  %27 = vperm.xlu0 %101, %v24_v2   ;;  %v97_v4 = vld [vmem:[%s144_s0 + $0x8] sm:$0xff]  ;;  %v96_v5 = vld [vmem:[%s144_s0] sm:$0xff] }
   0x3   :  { %v15_v6 = vld [vmem:[%s146_s1] sm:$0xf] }
   0x6   :  { %63 = vmatpush.bf16.msra.mxu0 %v98_v3 }
   0xa   :  { %64 = vmatpush.bf16.msra.mxu0 %v97_v4 }
   0xe   :  { %65 = vmatpush.bf16.msra.mxu0 %v96_v5 }
  0x11   :  { %95 = vmatmul.msk.bf16.vlgmr.msra.gmra.mxu0 %vm54_vm0, %v15_v6 }
  0x74   :  { %v28_v7 = vpop.permute.xlu0 %27 }
  0x8e   :  { %v67_v8 = vpop.f32.mrf.mxu0 }
  0x8f   :  { %v68_v9 = vadd.f32 %v67_v8, %v28_v7 }
  0x91   :  { %vm71_vm1 = vcmp.gt.f32.partialorder %v68_v9, 0.0  ;;  %v72_v10 = vmul.f32 0.2, %v68_v9 }
  0x93   :  { %v73_v11 = vsel %vm71_vm1, %v68_v9, %v72_v10 }
  0x94   :  { %74 = vst [vmem:[%s147_s3] sm:$0xff] %v73_v11 }
  0x96   :  { %v69_v12 = vpop.f32.mrf.mxu0 }

</bundles_post_ra>
